<compile_context>
chip_gen: v6e
topology: v6e:2x2x1
jax: 0.10.0
libtpu: 0.0.40
codegen_flags: <defaults>
</compile_context>

<pallas_src>
import functools

import numpy as np
import jax
import jax.numpy as jnp
from jax.experimental import pallas as pl
from jax.experimental.pallas import tpu as pltpu


# ----------------------------- small helpers --------------------------------

def _round_up(x, m):
    return ((int(x) + m - 1) // m) * m


def _elu(x):
    # torch.nn.ELU(alpha=1.0); clamp the exp argument so the unselected branch stays finite.
    return jnp.where(x > 0, x, jnp.exp(jnp.minimum(x, 0.0)) - 1.0)


# ------------------------------ parameters -----------------------------------

def init_params(key, fp_size, lstm_size):
    """Logical (unpadded) params.  Linear weights are [in, out]; biases [1, out]."""
    def linear(k, fan_in, fan_out, bias=True):
        k1, k2 = jax.random.split(k)
        bound = 1.0 / np.sqrt(fan_in)
        w = jax.random.uniform(k1, (fan_in, fan_out), jnp.float32, -bound, bound)
        b = (jax.random.uniform(k2, (1, fan_out), jnp.float32, -bound, bound)
             if bias else None)
        return w, b

    keys = jax.random.split(key, 10)
    p = {"fp_size": fp_size, "lstm_size": lstm_size}
    p["pfp_w1"], p["pfp_b1"] = linear(keys[0], fp_size, lstm_size)
    p["pfp_w2"], p["pfp_b2"] = linear(keys[1], lstm_size, lstm_size)
    p["rxn_w1"], p["rxn_b1"] = linear(keys[2], fp_size, lstm_size)
    p["rxn_w2"], p["rxn_b2"] = linear(keys[3], lstm_size, lstm_size)
    p["wiou"], p["biou"] = linear(keys[4], lstm_size, 3 * lstm_size)
    p["uiou"], _ = linear(keys[5], lstm_size, 3 * lstm_size, bias=False)
    p["wf"], p["bf"] = linear(keys[6], lstm_size, lstm_size)
    p["uf"], _ = linear(keys[7], lstm_size, lstm_size, bias=False)
    half = lstm_size // 2
    p["sc_w1"], p["sc_b1"] = linear(keys[8], lstm_size, half)
    p["sc_w2"], p["sc_b2"] = linear(keys[9], half, 1)
    return p


def pack_params(p):
    """Lane-pad feature dims to multiples of 128 and stack W/U pairs for merged matmuls.

    Zero padding is self-consistent: padded lanes of every activation / h / c stay 0.
    """
    L = p["lstm_size"]
    FP = p["fp_size"]
    LP = _round_up(L, 128)
    H = max(L // 2, 1)
    HP = _round_up(H, 128)

    def pad(w, rows, cols):
        out = jnp.zeros((rows, cols), jnp.float32)
        return out.at[: w.shape[0], : w.shape[1]].set(w)

    kp = {"L": L, "FP": FP, "LP": LP, "HP": HP}
    kp["w1p"] = pad(p["pfp_w1"], FP, LP)
    kp["b1p"] = pad(p["pfp_b1"], 1, LP)
    kp["w1r"] = pad(p["rxn_w1"], FP, LP)
    kp["b1r"] = pad(p["rxn_b1"], 1, LP)

    # fp layer 2 as block-diagonal so [hp | hr] @ w2blk handles both branches in one dot.
    w2blk = jnp.zeros((2 * LP, 2 * LP), jnp.float32)
    w2blk = w2blk.at[:L, :L].set(p["pfp_w2"])
    w2blk = w2blk.at[LP:LP + L, LP:LP + L].set(p["rxn_w2"])
    kp["w2blk"] = w2blk
    b2cat = jnp.zeros((1, 2 * LP), jnp.float32)
    b2cat = b2cat.at[:, :L].set(p["pfp_b2"]).at[:, LP:LP + L].set(p["rxn_b2"])
    kp["b2cat"] = b2cat

    # iou = [x | h_sum] @ [W_iou ; U_iou]; each i/o/u chunk padded to LP lanes.
    def pad_iou(w):
        out = jnp.zeros((LP, 3 * LP), jnp.float32)
        for k in range(3):
            out = out.at[:L, k * LP:k * LP + L].set(w[:, k * L:(k + 1) * L])
        return out

    kp["wiou_cat"] = jnp.concatenate([pad_iou(p["wiou"]), pad_iou(p["uiou"])], axis=0)
    biou = jnp.zeros((1, 3 * LP), jnp.float32)
    for k in range(3):
        biou = biou.at[:, k * LP:k * LP + L].set(p["biou"][:, k * L:(k + 1) * L])
    kp["biou"] = biou

    # f = sigmoid([x_parent | child_h] @ [W_f ; U_f] + b_f)
    kp["wf_cat"] = jnp.concatenate([pad(p["wf"], LP, LP), pad(p["uf"], LP, LP)], axis=0)
    kp["bf"] = pad(p["bf"], 1, LP)

    kp["sw1"] = pad(p["sc_w1"], LP, HP)
    kp["sb1"] = pad(p["sc_b1"], 1, HP)
    kp["sw2"] = pad(p["sc_w2"], HP, 128)   # lane-dense score slab; real score in column 0
    kp["sb2"] = pad(p["sc_b2"], 1, 128)
    return kp


# ------------------------- host-side level schedule ---------------------------

def build_plan(node_order, edge_order, adjacency_list, num_nodes):
    """Static (numpy) schedule: per-level node slots and one-hot gather/scatter matrices."""
    node_order = np.asarray(node_order, np.int64)
    edge_order = np.asarray(edge_order, np.int64)
    adj = np.asarray(adjacency_list, np.int64).reshape(-1, 2)
    num_nodes = np.asarray(num_nodes, np.int64)

    n_total = node_order.shape[0]
    num_levels = int(node_order.max()) + 1
    level_nodes = [np.where(node_order == n)[0] for n in range(num_levels)]
    level_edges = [np.where(edge_order == n)[0] for n in range(num_levels)]

    max_n = _round_up(max(len(v) for v in level_nodes), 8)
    max_e = _round_up(max([len(v) for v in level_edges] + [1]), 8)
    rows_in = num_levels * max_n                 # sorted fingerprint rows (per-level slots)
    rows_state = _round_up(rows_in, 128)         # resident h/c rows (128-aligned matmul K)

    new_row = np.zeros(n_total, np.int64)
    sort_idx = np.zeros(rows_in, np.int64)
    for n, nodes in enumerate(level_nodes):
        new_row[nodes] = n * max_n + np.arange(len(nodes))
        sort_idx[n * max_n:n * max_n + len(nodes)] = nodes

    G = np.zeros((num_levels, max_e, rows_state), np.float32)  # edge -> child state row
    S = np.zeros((num_levels, max_n, max_e), np.float32)       # edge -> parent slot (sum)
    A = np.zeros((num_levels, max_e, max_n), np.float32)       # parent slot -> edge
    for n in range(num_levels):
        e_idx = level_edges[n]
        if len(e_idx) == 0:
            continue
        parents = adj[e_idx, 0]
        children = adj[e_idx, 1]
        p_local = new_row[parents] - n * max_n
        assert np.all((p_local >= 0) & (p_local < len(level_nodes[n]))), \
            "edge_order level must match the parent's node_order level"
        c_rows = new_row[children]
        e_rng = np.arange(len(e_idx))
        G[n, e_rng, c_rows] = 1.0
        S[n, p_local, e_rng] = 1.0
        A[n, e_rng, p_local] = 1.0

    n_trees = int(num_nodes.shape[0])
    t_pad = _round_up(n_trees, 8)
    roots = np.concatenate([[0], np.cumsum(num_nodes)[:-1]])
    R = np.zeros((t_pad, rows_state), np.float32)
    R[np.arange(n_trees), new_row[roots]] = 1.0

    return dict(num_levels=num_levels, max_n=max_n, max_e=max_e,
                rows_in=rows_in, rows_state=rows_state,
                n_trees=n_trees, t_pad=t_pad,
                sort_idx=sort_idx, G=G, S=S, A=A, R=R)


# ------------------------------ fused kernel ----------------------------------

def _make_kernel(max_n, lp):
    def kernel(pfp_ref, rxn_ref, g_ref, s_ref, a_ref, r_ref,
               w1p_ref, b1p_ref, w1r_ref, b1r_ref, w2_ref, b2_ref,
               wiou_ref, biou_ref, wf_ref, bf_ref,
               sw1_ref, sb1_ref, sw2_ref, sb2_ref,
               score_ref, enc_ref, h_ref, c_ref):
        n = pl.program_id(0)
        dot = functools.partial(jnp.dot, preferred_element_type=jnp.float32)

        @pl.when(n == 0)
        def _init():
            h_ref[...] = jnp.zeros_like(h_ref)
            c_ref[...] = jnp.zeros_like(c_ref)

        # --- fused fingerprint MLPs for this level's node block --------------
        hp = _elu(dot(pfp_ref[...], w1p_ref[...]) + b1p_ref[...])
        hr = _elu(dot(rxn_ref[...], w1r_ref[...]) + b1r_ref[...])
        h1 = jnp.concatenate([hp, hr], axis=-1)                     # (max_n, 2*lp)
        h2 = jnp.maximum(dot(h1, w2_ref[...]) + b2_ref[...], 0.0)
        x = jnp.tanh(h2[:, :lp] * h2[:, lp:])                       # (max_n, lp)

        # --- child gather from resident h/c via one-hot matmuls ---------------
        child_h = dot(g_ref[...], h_ref[...])                       # (max_e, lp)
        child_c = dot(g_ref[...], c_ref[...])
        h_sum = dot(s_ref[...], child_h)                            # (max_n, lp)

        # --- per-edge forget gates (merged [x_parent | child_h] @ [Wf ; Uf]) --
        xp = dot(a_ref[...], x)                                     # (max_e, lp)
        f = jax.nn.sigmoid(dot(jnp.concatenate([xp, child_h], axis=-1),
                               wf_ref[...]) + bf_ref[...])
        c_sum = dot(s_ref[...], f * child_c)                        # (max_n, lp)

        # --- node gates (merged [x | h_sum] @ [Wiou ; Uiou]) -------------------
        iou = dot(jnp.concatenate([x, h_sum], axis=-1), wiou_ref[...]) + biou_ref[...]
        i = jax.nn.sigmoid(iou[:, :lp])
        o = jax.nn.sigmoid(iou[:, lp:2 * lp])
        u = jnp.tanh(iou[:, 2 * lp:])
        c_new = i * u + c_sum
        h_new = o * jnp.tanh(c_new)

        row0 = pl.multiple_of(n * max_n, max_n)
        h_ref[pl.ds(row0, max_n), :] = h_new
        c_ref[pl.ds(row0, max_n), :] = c_new

        # --- scorer on the final level -----------------------------------------
        @pl.when(n == pl.num_programs(0) - 1)
        def _finish():
            roots = dot(r_ref[...], h_ref[...])                     # (t_pad, lp)
            enc_ref[...] = roots
            s1 = jnp.maximum(dot(roots, sw1_ref[...]) + sb1_ref[...], 0.0)
            score_ref[...] = dot(s1, sw2_ref[...]) + sb2_ref[...]

    return kernel


# ------------------------------ forward pass ----------------------------------

def pathway_ranking_forward(params, pfp, rxnfp, adjacency_list, node_order,
                            edge_order, num_nodes, encoder=False):
    kp = pack_params(params)
    plan = build_plan(node_order, edge_order, adjacency_list, num_nodes)

    L, FP, LP = kp["L"], kp["FP"], kp["LP"]
    max_n, num_levels = plan["max_n"], plan["num_levels"]
    rows_state, t_pad = plan["rows_state"], plan["t_pad"]

    # one gather to lay the fingerprints out in per-level slots
    sort_idx = jnp.asarray(plan["sort_idx"], jnp.int32)
    pfp_s = jnp.take(pfp.astype(jnp.float32), sort_idx, axis=0)
    rxn_s = jnp.take(rxnfp.astype(jnp.float32), sort_idx, axis=0)

    def full_spec(arr):
        return pl.BlockSpec(arr.shape, lambda n, nd=arr.ndim: (0,) * nd)

    def level_spec(arr):
        return pl.BlockSpec((None,) + arr.shape[1:], lambda n: (n, 0, 0))

    in_arrays = [
        pfp_s, rxn_s,
        jnp.asarray(plan["G"]), jnp.asarray(plan["S"]), jnp.asarray(plan["A"]),
        jnp.asarray(plan["R"]),
        kp["w1p"], kp["b1p"], kp["w1r"], kp["b1r"], kp["w2blk"], kp["b2cat"],
        kp["wiou_cat"], kp["biou"], kp["wf_cat"], kp["bf"],
        kp["sw1"], kp["sb1"], kp["sw2"], kp["sb2"],
    ]
    in_specs = [
        pl.BlockSpec((max_n, FP), lambda n: (n, 0)),
        pl.BlockSpec((max_n, FP), lambda n: (n, 0)),
        level_spec(in_arrays[2]), level_spec(in_arrays[3]), level_spec(in_arrays[4]),
        full_spec(in_arrays[5]),
    ] + [full_spec(a) for a in in_arrays[6:]]

    out_shape = (jax.ShapeDtypeStruct((t_pad, 128), jnp.float32),
                 jax.ShapeDtypeStruct((t_pad, LP), jnp.float32))
    out_specs = (pl.BlockSpec((t_pad, 128), lambda n: (0, 0)),
                 pl.BlockSpec((t_pad, LP), lambda n: (0, 0)))

    grid_spec = pltpu.PrefetchScalarGridSpec(
        num_scalar_prefetch=0,
        grid=(num_levels,),
        in_specs=in_specs,
        out_specs=out_specs,
        scratch_shapes=[pltpu.VMEM((rows_state, LP), jnp.float32),   # h
                        pltpu.VMEM((rows_state, LP), jnp.float32)],  # c
    )

    fn = pl.pallas_call(
        _make_kernel(max_n, LP),
        grid_spec=grid_spec,
        out_shape=out_shape,
        compiler_params=pltpu.CompilerParams(
            dimension_semantics=("arbitrary",),      # levels are sequentially dependent
            vmem_limit_bytes=32 * 1024 * 1024,
        ),
    )
    score_pad, enc_pad = fn(*in_arrays)

    score = score_pad[:plan["n_trees"], :1]
    if encoder:
        return score, enc_pad[:plan["n_trees"], :L]
    return score
    # TODO(synk): a leading "parallel" grid axis over independent trees would use the
    # second TensorCore on v7x; omitted here to keep a single portable sequential grid.


# --------------------------- pure-JAX reference -------------------------------

def reference_forward(params, pfp, rxnfp, adjacency_list, node_order, edge_order, num_nodes):
    L = params["lstm_size"]

    def branch(xx, w1, b1, w2, b2):
        return jnp.maximum(_elu(xx @ w1 + b1) @ w2 + b2, 0.0)

    p_out = branch(pfp, params["pfp_w1"], params["pfp_b1"], params["pfp_w2"], params["pfp_b2"])
    r_out = branch(rxnfp, params["rxn_w1"], params["rxn_b1"], params["rxn_w2"], params["rxn_b2"])
    feats = jnp.tanh(p_out * r_out)

    node_order = np.asarray(node_order)
    edge_order = np.asarray(edge_order)
    adjacency_list = np.asarray(adjacency_list).reshape(-1, 2)
    h = jnp.zeros((pfp.shape[0], L), jnp.float32)
    c = jnp.zeros((pfp.shape[0], L), jnp.float32)

    for n in range(int(node_order.max()) + 1):
        active = np.where(node_order == n)[0]
        x = feats[active]
        if n == 0:
            iou = x @ params["wiou"] + params["biou"]
            csum = 0.0
        else:
            e_active = np.where(edge_order == n)[0]
            parents = adjacency_list[e_active, 0]
            children = adjacency_list[e_active, 1]
            seg = jnp.asarray(np.searchsorted(active, parents).astype(np.int32))
            child_h, child_c = h[children], c[children]
            hsum = jax.ops.segment_sum(child_h, seg, num_segments=len(active))
            iou = x @ params["wiou"] + params["biou"] + hsum @ params["uiou"]
            f = jax.nn.sigmoid(feats[parents] @ params["wf"] + params["bf"]
                               + child_h @ params["uf"])
            csum = jax.ops.segment_sum(f * child_c, seg, num_segments=len(active))
        i = jax.nn.sigmoid(iou[:, :L])
        o = jax.nn.sigmoid(iou[:, L:2 * L])
        u = jnp.tanh(iou[:, 2 * L:])
        c_new = i * u + csum
        c = c.at[active].set(c_new)
        h = h.at[active].set(o * jnp.tanh(c_new))

    roots = np.concatenate([[0], np.cumsum(np.asarray(num_nodes))[:-1]])
    si = h[roots]
    s1 = jnp.maximum(si @ params["sc_w1"] + params["sc_b1"], 0.0)
    return s1 @ params["sc_w2"] + params["sc_b2"]


# ---------------------------------- main --------------------------------------

if __name__ == "__main__":
    fp_size, lstm_size = 64, 32
    key = jax.random.PRNGKey(0)
    k_par, k_pfp, k_rxn = jax.random.split(key, 3)
    params = init_params(k_par, fp_size, lstm_size)

    # Two trees, 8 nodes total.
    # Tree 0 (nodes 0-4): 0 <- {1, 2}, 1 <- {3, 4}.  Tree 1 (nodes 5-7): 5 <- {6, 7}.
    node_order = np.array([2, 1, 0, 0, 0, 1, 0, 0], dtype=np.int64)
    adjacency_list = np.array(
        [[0, 1], [0, 2], [1, 3], [1, 4], [5, 6], [5, 7]], dtype=np.int64)
    edge_order = np.array([2, 2, 1, 1, 1, 1], dtype=np.int64)
    num_nodes = [5, 3]

    pfp = jax.random.normal(k_pfp, (8, fp_size), jnp.float32)
    rxnfp = jax.random.normal(k_rxn, (8, fp_size), jnp.float32)

    score = pathway_ranking_forward(params, pfp, rxnfp, adjacency_list,
                                    node_order, edge_order, num_nodes)
    score = jax.block_until_ready(score)

    ref = jax.block_until_ready(
        reference_forward(params, pfp, rxnfp, adjacency_list, node_order,
                          edge_order, num_nodes))

    assert score.shape == (2, 1)
    np.testing.assert_allclose(np.asarray(score), np.asarray(ref), rtol=1e-4, atol=1e-4)

    print("KERNEL_OK")
</pallas_src>

<mosaic_0001>
module attributes {stable_mosaic.version = 11 : i64} {
  func.func @kernel(%arg0: i32, %arg1: memref<8x64xf32, #tpu.memory_space<vmem>>, %arg2: memref<8x64xf32, #tpu.memory_space<vmem>>, %arg3: memref<1x8x128xf32, #tpu.memory_space<vmem>>, %arg4: memref<1x8x8xf32, #tpu.memory_space<vmem>>, %arg5: memref<1x8x8xf32, #tpu.memory_space<vmem>>, %arg6: memref<8x128xf32, #tpu.memory_space<vmem>>, %arg7: memref<64x128xf32, #tpu.memory_space<vmem>>, %arg8: memref<1x128xf32, #tpu.memory_space<vmem>>, %arg9: memref<64x128xf32, #tpu.memory_space<vmem>>, %arg10: memref<1x128xf32, #tpu.memory_space<vmem>>, %arg11: memref<256x256xf32, #tpu.memory_space<vmem>>, %arg12: memref<1x256xf32, #tpu.memory_space<vmem>>, %arg13: memref<256x384xf32, #tpu.memory_space<vmem>>, %arg14: memref<1x384xf32, #tpu.memory_space<vmem>>, %arg15: memref<256x128xf32, #tpu.memory_space<vmem>>, %arg16: memref<1x128xf32, #tpu.memory_space<vmem>>, %arg17: memref<128x128xf32, #tpu.memory_space<vmem>>, %arg18: memref<1x128xf32, #tpu.memory_space<vmem>>, %arg19: memref<128x128xf32, #tpu.memory_space<vmem>>, %arg20: memref<1x128xf32, #tpu.memory_space<vmem>>, %arg21: memref<8x128xf32, #tpu.memory_space<vmem>>, %arg22: memref<8x128xf32, #tpu.memory_space<vmem>>, %arg23: memref<128x128xf32, #tpu.memory_space<vmem>>, %arg24: memref<128x128xf32, #tpu.memory_space<vmem>>) attributes {dimension_semantics = [#tpu.dimension_semantics<arbitrary>], iteration_bounds = array<i64: 3>, scalar_prefetch = 0 : i64, scratch_operands = 2 : i64, tpu.core_type = #tpu.core_type<tc>, window_params = [{transform_indices = @transform_0, window_bounds = array<i64: 8, 64>}, {transform_indices = @transform_1, window_bounds = array<i64: 8, 64>}, {transform_indices = @transform_2, window_bounds = array<i64: 1, 8, 128>}, {transform_indices = @transform_3, window_bounds = array<i64: 1, 8, 8>}, {transform_indices = @transform_4, window_bounds = array<i64: 1, 8, 8>}, {pipeline_mode = #tpu.pipeline_mode<synchronous>, transform_indices = @transform_5, window_bounds = array<i64: 8, 128>}, {pipeline_mode = #tpu.pipeline_mode<synchronous>, transform_indices = @transform_6, window_bounds = array<i64: 64, 128>}, {pipeline_mode = #tpu.pipeline_mode<synchronous>, transform_indices = @transform_7, window_bounds = array<i64: 1, 128>}, {pipeline_mode = #tpu.pipeline_mode<synchronous>, transform_indices = @transform_8, window_bounds = array<i64: 64, 128>}, {pipeline_mode = #tpu.pipeline_mode<synchronous>, transform_indices = @transform_9, window_bounds = array<i64: 1, 128>}, {pipeline_mode = #tpu.pipeline_mode<synchronous>, transform_indices = @transform_10, window_bounds = array<i64: 256, 256>}, {pipeline_mode = #tpu.pipeline_mode<synchronous>, transform_indices = @transform_11, window_bounds = array<i64: 1, 256>}, {pipeline_mode = #tpu.pipeline_mode<synchronous>, transform_indices = @transform_12, window_bounds = array<i64: 256, 384>}, {pipeline_mode = #tpu.pipeline_mode<synchronous>, transform_indices = @transform_13, window_bounds = array<i64: 1, 384>}, {pipeline_mode = #tpu.pipeline_mode<synchronous>, transform_indices = @transform_14, window_bounds = array<i64: 256, 128>}, {pipeline_mode = #tpu.pipeline_mode<synchronous>, transform_indices = @transform_15, window_bounds = array<i64: 1, 128>}, {pipeline_mode = #tpu.pipeline_mode<synchronous>, transform_indices = @transform_16, window_bounds = array<i64: 128, 128>}, {pipeline_mode = #tpu.pipeline_mode<synchronous>, transform_indices = @transform_17, window_bounds = array<i64: 1, 128>}, {pipeline_mode = #tpu.pipeline_mode<synchronous>, transform_indices = @transform_18, window_bounds = array<i64: 128, 128>}, {pipeline_mode = #tpu.pipeline_mode<synchronous>, transform_indices = @transform_19, window_bounds = array<i64: 1, 128>}, {pipeline_mode = #tpu.pipeline_mode<synchronous>, transform_indices = @transform_20, window_bounds = array<i64: 8, 128>}, {pipeline_mode = #tpu.pipeline_mode<synchronous>, transform_indices = @transform_21, window_bounds = array<i64: 8, 128>}]} {
    %c0_i32 = arith.constant 0 : i32
    %0 = arith.cmpi eq, %arg0, %c0_i32 : i32
    %1 = arith.extui %0 : i1 to i32
    %c0_i32_0 = arith.constant 0 : i32
    %2 = arith.cmpi ne, %1, %c0_i32_0 : i32
    scf.if %2 {
      %cst_65 = arith.constant 0.000000e+00 : f32
      %105 = vector.broadcast %cst_65 : f32 to vector<128x128xf32>
      %c0_66 = arith.constant 0 : index
      %c0_67 = arith.constant 0 : index
      %106 = vector.load %arg23[%c0_66, %c0_67] : memref<128x128xf32, #tpu.memory_space<vmem>>, vector<128x128xf32>
      tpu.vector_store %arg23[%c0_66, %c0_67], %105 {strides = array<i32>} : memref<128x128xf32, #tpu.memory_space<vmem>>, vector<128x128xf32>,
      %cst_68 = arith.constant 0.000000e+00 : f32
      %107 = vector.broadcast %cst_68 : f32 to vector<128x128xf32>
      %c0_69 = arith.constant 0 : index
      %c0_70 = arith.constant 0 : index
      %108 = vector.load %arg24[%c0_69, %c0_70] : memref<128x128xf32, #tpu.memory_space<vmem>>, vector<128x128xf32>
      tpu.vector_store %arg24[%c0_69, %c0_70], %107 {strides = array<i32>} : memref<128x128xf32, #tpu.memory_space<vmem>>, vector<128x128xf32>,
    } else {
    }
    %c0 = arith.constant 0 : index
    %c0_1 = arith.constant 0 : index
    %3 = vector.load %arg1[%c0, %c0_1] : memref<8x64xf32, #tpu.memory_space<vmem>>, vector<8x64xf32>
    %c0_2 = arith.constant 0 : index
    %c0_3 = arith.constant 0 : index
    %4 = vector.load %arg7[%c0_2, %c0_3] : memref<64x128xf32, #tpu.memory_space<vmem>>, vector<64x128xf32>
    %cst = arith.constant dense<0.000000e+00> : vector<8x128xf32>
    %5 = tpu.matmul %3, %4, %cst {dimension_numbers = #tpu.dot_dimension_numbers<[1], [0], [0], [1], [0, 0, 1, 1], [], []>} : vector<8x64xf32>, vector<64x128xf32>, vector<8x128xf32> -> vector<8x128xf32>
    %c0_4 = arith.constant 0 : index
    %c0_5 = arith.constant 0 : index
    %6 = vector.load %arg8[%c0_4, %c0_5] : memref<1x128xf32, #tpu.memory_space<vmem>>, vector<1x128xf32>
    %7 = vector.broadcast %6 : vector<1x128xf32> to vector<8x128xf32>
    %8 = arith.addf %5, %7 : vector<8x128xf32>
    %cst_6 = arith.constant 0.000000e+00 : f32
    %9 = vector.broadcast %cst_6 : f32 to vector<8x128xf32>
    %10 = arith.cmpf ogt, %8, %9 : vector<8x128xf32>
    %cst_7 = arith.constant 0.000000e+00 : f32
    %11 = vector.broadcast %cst_7 : f32 to vector<8x128xf32>
    %12 = arith.minimumf %8, %11 : vector<8x128xf32>
    %13 = math.exp %12 : vector<8x128xf32>
    %cst_8 = arith.constant 1.000000e+00 : f32
    %14 = vector.broadcast %cst_8 : f32 to vector<8x128xf32>
    %15 = arith.subf %13, %14 : vector<8x128xf32>
    %16 = arith.select %10, %8, %15 : vector<8x128xi1>, vector<8x128xf32>
    %c0_9 = arith.constant 0 : index
    %c0_10 = arith.constant 0 : index
    %17 = vector.load %arg2[%c0_9, %c0_10] : memref<8x64xf32, #tpu.memory_space<vmem>>, vector<8x64xf32>
    %c0_11 = arith.constant 0 : index
    %c0_12 = arith.constant 0 : index
    %18 = vector.load %arg9[%c0_11, %c0_12] : memref<64x128xf32, #tpu.memory_space<vmem>>, vector<64x128xf32>
    %cst_13 = arith.constant dense<0.000000e+00> : vector<8x128xf32>
    %19 = tpu.matmul %17, %18, %cst_13 {dimension_numbers = #tpu.dot_dimension_numbers<[1], [0], [0], [1], [0, 0, 1, 1], [], []>} : vector<8x64xf32>, vector<64x128xf32>, vector<8x128xf32> -> vector<8x128xf32>
    %c0_14 = arith.constant 0 : index
    %c0_15 = arith.constant 0 : index
    %20 = vector.load %arg10[%c0_14, %c0_15] : memref<1x128xf32, #tpu.memory_space<vmem>>, vector<1x128xf32>
    %21 = vector.broadcast %20 : vector<1x128xf32> to vector<8x128xf32>
    %22 = arith.addf %19, %21 : vector<8x128xf32>
    %cst_16 = arith.constant 0.000000e+00 : f32
    %23 = vector.broadcast %cst_16 : f32 to vector<8x128xf32>
    %24 = arith.cmpf ogt, %22, %23 : vector<8x128xf32>
    %cst_17 = arith.constant 0.000000e+00 : f32
    %25 = vector.broadcast %cst_17 : f32 to vector<8x128xf32>
    %26 = arith.minimumf %22, %25 : vector<8x128xf32>
    %27 = math.exp %26 : vector<8x128xf32>
    %cst_18 = arith.constant 1.000000e+00 : f32
    %28 = vector.broadcast %cst_18 : f32 to vector<8x128xf32>
    %29 = arith.subf %27, %28 : vector<8x128xf32>
    %30 = arith.select %24, %22, %29 : vector<8x128xi1>, vector<8x128xf32>
    %31 = tpu.concatenate %16, %30 in 1 : vector<8x128xf32>, vector<8x128xf32> -> vector<8x256xf32>
    %c0_19 = arith.constant 0 : index
    %c0_20 = arith.constant 0 : index
    %32 = vector.load %arg11[%c0_19, %c0_20] : memref<256x256xf32, #tpu.memory_space<vmem>>, vector<256x256xf32>
    %cst_21 = arith.constant dense<0.000000e+00> : vector<8x256xf32>
    %33 = tpu.matmul %31, %32, %cst_21 {dimension_numbers = #tpu.dot_dimension_numbers<[1], [0], [0], [1], [0, 0, 1, 1], [], []>} : vector<8x256xf32>, vector<256x256xf32>, vector<8x256xf32> -> vector<8x256xf32>
    %c0_22 = arith.constant 0 : index
    %c0_23 = arith.constant 0 : index
    %34 = vector.load %arg12[%c0_22, %c0_23] : memref<1x256xf32, #tpu.memory_space<vmem>>, vector<1x256xf32>
    %35 = vector.broadcast %34 : vector<1x256xf32> to vector<8x256xf32>
    %36 = arith.addf %33, %35 : vector<8x256xf32>
    %cst_24 = arith.constant 0.000000e+00 : f32
    %37 = vector.broadcast %cst_24 : f32 to vector<8x256xf32>
    %38 = arith.maximumf %36, %37 : vector<8x256xf32>
    %39 = vector.extract_strided_slice %38 {offsets = [0, 0], sizes = [8, 128], strides = [1, 1]} : vector<8x256xf32> to vector<8x128xf32>
    %40 = vector.extract_strided_slice %38 {offsets = [0, 128], sizes = [8, 128], strides = [1, 1]} : vector<8x256xf32> to vector<8x128xf32>
    %41 = arith.mulf %39, %40 : vector<8x128xf32>
    %42 = math.tanh %41 : vector<8x128xf32>
    %c0_25 = arith.constant 0 : index
    %c0_26 = arith.constant 0 : index
    %c0_27 = arith.constant 0 : index
    %43 = vector.load %arg3[%c0_25, %c0_26, %c0_27] : memref<1x8x128xf32, #tpu.memory_space<vmem>>, vector<1x8x128xf32>
    %44 = vector.shape_cast %43 : vector<1x8x128xf32> to vector<8x128xf32>
    %c0_28 = arith.constant 0 : index
    %c0_29 = arith.constant 0 : index
    %45 = vector.load %arg23[%c0_28, %c0_29] : memref<128x128xf32, #tpu.memory_space<vmem>>, vector<128x128xf32>
    %cst_30 = arith.constant dense<0.000000e+00> : vector<8x128xf32>
    %46 = tpu.matmul %44, %45, %cst_30 {dimension_numbers = #tpu.dot_dimension_numbers<[1], [0], [0], [1], [0, 0, 1, 1], [], []>} : vector<8x128xf32>, vector<128x128xf32>, vector<8x128xf32> -> vector<8x128xf32>
    %c0_31 = arith.constant 0 : index
    %c0_32 = arith.constant 0 : index
    %c0_33 = arith.constant 0 : index
    %47 = vector.load %arg3[%c0_31, %c0_32, %c0_33] : memref<1x8x128xf32, #tpu.memory_space<vmem>>, vector<1x8x128xf32>
    %48 = vector.shape_cast %47 : vector<1x8x128xf32> to vector<8x128xf32>
    %c0_34 = arith.constant 0 : index
    %c0_35 = arith.constant 0 : index
    %49 = vector.load %arg24[%c0_34, %c0_35] : memref<128x128xf32, #tpu.memory_space<vmem>>, vector<128x128xf32>
    %cst_36 = arith.constant dense<0.000000e+00> : vector<8x128xf32>
    %50 = tpu.matmul %48, %49, %cst_36 {dimension_numbers = #tpu.dot_dimension_numbers<[1], [0], [0], [1], [0, 0, 1, 1], [], []>} : vector<8x128xf32>, vector<128x128xf32>, vector<8x128xf32> -> vector<8x128xf32>
    %c0_37 = arith.constant 0 : index
    %c0_38 = arith.constant 0 : index
    %c0_39 = arith.constant 0 : index
    %51 = vector.load %arg4[%c0_37, %c0_38, %c0_39] : memref<1x8x8xf32, #tpu.memory_space<vmem>>, vector<1x8x8xf32>
    %52 = vector.shape_cast %51 : vector<1x8x8xf32> to vector<8x8xf32>
    %cst_40 = arith.constant dense<0.000000e+00> : vector<8x128xf32>
    %53 = tpu.matmul %52, %46, %cst_40 {dimension_numbers = #tpu.dot_dimension_numbers<[1], [0], [0], [1], [0, 0, 1, 1], [], []>} : vector<8x8xf32>, vector<8x128xf32>, vector<8x128xf32> -> vector<8x128xf32>
    %c0_41 = arith.constant 0 : index
    %c0_42 = arith.constant 0 : index
    %c0_43 = arith.constant 0 : index
    %54 = vector.load %arg5[%c0_41, %c0_42, %c0_43] : memref<1x8x8xf32, #tpu.memory_space<vmem>>, vector<1x8x8xf32>
    %55 = vector.shape_cast %54 : vector<1x8x8xf32> to vector<8x8xf32>
    %cst_44 = arith.constant dense<0.000000e+00> : vector<8x128xf32>
    %56 = tpu.matmul %55, %42, %cst_44 {dimension_numbers = #tpu.dot_dimension_numbers<[1], [0], [0], [1], [0, 0, 1, 1], [], []>} : vector<8x8xf32>, vector<8x128xf32>, vector<8x128xf32> -> vector<8x128xf32>
    %57 = tpu.concatenate %56, %46 in 1 : vector<8x128xf32>, vector<8x128xf32> -> vector<8x256xf32>
    %c0_45 = arith.constant 0 : index
    %c0_46 = arith.constant 0 : index
    %58 = vector.load %arg15[%c0_45, %c0_46] : memref<256x128xf32, #tpu.memory_space<vmem>>, vector<256x128xf32>
    %cst_47 = arith.constant dense<0.000000e+00> : vector<8x128xf32>
    %59 = tpu.matmul %57, %58, %cst_47 {dimension_numbers = #tpu.dot_dimension_numbers<[1], [0], [0], [1], [0, 0, 1, 1], [], []>} : vector<8x256xf32>, vector<256x128xf32>, vector<8x128xf32> -> vector<8x128xf32>
    %c0_48 = arith.constant 0 : index
    %c0_49 = arith.constant 0 : index
    %60 = vector.load %arg16[%c0_48, %c0_49] : memref<1x128xf32, #tpu.memory_space<vmem>>, vector<1x128xf32>
    %61 = vector.broadcast %60 : vector<1x128xf32> to vector<8x128xf32>
    %62 = arith.addf %59, %61 : vector<8x128xf32>
    %63 = arith.negf %62 : vector<8x128xf32>
    %64 = math.exp %63 : vector<8x128xf32>
    %cst_50 = arith.constant 1.000000e+00 : f32
    %65 = vector.broadcast %cst_50 : f32 to vector<8x128xf32>
    %66 = arith.addf %65, %64 : vector<8x128xf32>
    %67 = arith.divf %65, %66 : vector<8x128xf32>
    %c0_51 = arith.constant 0 : index
    %c0_52 = arith.constant 0 : index
    %c0_53 = arith.constant 0 : index
    %68 = vector.load %arg4[%c0_51, %c0_52, %c0_53] : memref<1x8x8xf32, #tpu.memory_space<vmem>>, vector<1x8x8xf32>
    %69 = vector.shape_cast %68 : vector<1x8x8xf32> to vector<8x8xf32>
    %70 = arith.mulf %67, %50 : vector<8x128xf32>
    %cst_54 = arith.constant dense<0.000000e+00> : vector<8x128xf32>
    %71 = tpu.matmul %69, %70, %cst_54 {dimension_numbers = #tpu.dot_dimension_numbers<[1], [0], [0], [1], [0, 0, 1, 1], [], []>} : vector<8x8xf32>, vector<8x128xf32>, vector<8x128xf32> -> vector<8x128xf32>
    %72 = tpu.concatenate %42, %53 in 1 : vector<8x128xf32>, vector<8x128xf32> -> vector<8x256xf32>
    %c0_55 = arith.constant 0 : index
    %c0_56 = arith.constant 0 : index
    %73 = vector.load %arg13[%c0_55, %c0_56] : memref<256x384xf32, #tpu.memory_space<vmem>>, vector<256x384xf32>
    %cst_57 = arith.constant dense<0.000000e+00> : vector<8x384xf32>
    %74 = tpu.matmul %72, %73, %cst_57 {dimension_numbers = #tpu.dot_dimension_numbers<[1], [0], [0], [1], [0, 0, 1, 1], [], []>} : vector<8x256xf32>, vector<256x384xf32>, vector<8x384xf32> -> vector<8x384xf32>
    %c0_58 = arith.constant 0 : index
    %c0_59 = arith.constant 0 : index
    %75 = vector.load %arg14[%c0_58, %c0_59] : memref<1x384xf32, #tpu.memory_space<vmem>>, vector<1x384xf32>
    %76 = vector.broadcast %75 : vector<1x384xf32> to vector<8x384xf32>
    %77 = arith.addf %74, %76 : vector<8x384xf32>
    %78 = vector.extract_strided_slice %77 {offsets = [0, 0], sizes = [8, 128], strides = [1, 1]} : vector<8x384xf32> to vector<8x128xf32>
    %79 = arith.negf %78 : vector<8x128xf32>
    %80 = math.exp %79 : vector<8x128xf32>
    %cst_60 = arith.constant 1.000000e+00 : f32
    %81 = vector.broadcast %cst_60 : f32 to vector<8x128xf32>
    %82 = arith.addf %81, %80 : vector<8x128xf32>
    %83 = arith.divf %81, %82 : vector<8x128xf32>
    %84 = vector.extract_strided_slice %77 {offsets = [0, 128], sizes = [8, 128], strides = [1, 1]} : vector<8x384xf32> to vector<8x128xf32>
    %85 = arith.negf %84 : vector<8x128xf32>
    %86 = math.exp %85 : vector<8x128xf32>
    %cst_61 = arith.constant 1.000000e+00 : f32
    %87 = vector.broadcast %cst_61 : f32 to vector<8x128xf32>
    %88 = arith.addf %87, %86 : vector<8x128xf32>
    %89 = arith.divf %87, %88 : vector<8x128xf32>
    %90 = vector.extract_strided_slice %77 {offsets = [0, 256], sizes = [8, 128], strides = [1, 1]} : vector<8x384xf32> to vector<8x128xf32>
    %91 = math.tanh %90 : vector<8x128xf32>
    %92 = arith.mulf %83, %91 : vector<8x128xf32>
    %93 = arith.addf %92, %71 : vector<8x128xf32>
    %94 = math.tanh %93 : vector<8x128xf32>
    %95 = arith.mulf %89, %94 : vector<8x128xf32>
    %c8_i32 = arith.constant 8 : i32
    %96 = arith.muli %arg0, %c8_i32 : i32
    %97 = tpu.assume_multiple %96, 8 : i32
    %98 = arith.index_cast %97 : i32 to index
    %c0_62 = arith.constant 0 : index
    %99 = vector.load %arg23[%98, %c0_62] : memref<128x128xf32, #tpu.memory_space<vmem>>, vector<8x128xf32>
    tpu.vector_store %arg23[%98, %c0_62], %95 {strides = array<i32>} : memref<128x128xf32, #tpu.memory_space<vmem>>, vector<8x128xf32>,
    %100 = arith.index_cast %97 : i32 to index
    %c0_63 = arith.constant 0 : index
    %101 = vector.load %arg24[%100, %c0_63] : memref<128x128xf32, #tpu.memory_space<vmem>>, vector<8x128xf32>
    tpu.vector_store %arg24[%100, %c0_63], %93 {strides = array<i32>} : memref<128x128xf32, #tpu.memory_space<vmem>>, vector<8x128xf32>,
    %c2_i32 = arith.constant 2 : i32
    %102 = arith.cmpi eq, %arg0, %c2_i32 : i32
    %103 = arith.extui %102 : i1 to i32
    %c0_i32_64 = arith.constant 0 : i32
    %104 = arith.cmpi ne, %103, %c0_i32_64 : i32
    scf.if %104 {
      %c0_65 = arith.constant 0 : index
      %c0_66 = arith.constant 0 : index
      %105 = vector.load %arg6[%c0_65, %c0_66] : memref<8x128xf32, #tpu.memory_space<vmem>>, vector<8x128xf32>
      %c0_67 = arith.constant 0 : index
      %c0_68 = arith.constant 0 : index
      %106 = vector.load %arg23[%c0_67, %c0_68] : memref<128x128xf32, #tpu.memory_space<vmem>>, vector<128x128xf32>
      %cst_69 = arith.constant dense<0.000000e+00> : vector<8x128xf32>
      %107 = tpu.matmul %105, %106, %cst_69 {dimension_numbers = #tpu.dot_dimension_numbers<[1], [0], [0], [1], [0, 0, 1, 1], [], []>} : vector<8x128xf32>, vector<128x128xf32>, vector<8x128xf32> -> vector<8x128xf32>
      %c0_70 = arith.constant 0 : index
      %c0_71 = arith.constant 0 : index
      %108 = vector.load %arg22[%c0_70, %c0_71] : memref<8x128xf32, #tpu.memory_space<vmem>>, vector<8x128xf32>
      tpu.vector_store %arg22[%c0_70, %c0_71], %107 {strides = array<i32>} : memref<8x128xf32, #tpu.memory_space<vmem>>, vector<8x128xf32>,
      %c0_72 = arith.constant 0 : index
      %c0_73 = arith.constant 0 : index
      %109 = vector.load %arg17[%c0_72, %c0_73] : memref<128x128xf32, #tpu.memory_space<vmem>>, vector<128x128xf32>
      %cst_74 = arith.constant dense<0.000000e+00> : vector<8x128xf32>
      %110 = tpu.matmul %107, %109, %cst_74 {dimension_numbers = #tpu.dot_dimension_numbers<[1], [0], [0], [1], [0, 0, 1, 1], [], []>} : vector<8x128xf32>, vector<128x128xf32>, vector<8x128xf32> -> vector<8x128xf32>
      %c0_75 = arith.constant 0 : index
      %c0_76 = arith.constant 0 : index
      %111 = vector.load %arg18[%c0_75, %c0_76] : memref<1x128xf32, #tpu.memory_space<vmem>>, vector<1x128xf32>
      %112 = vector.broadcast %111 : vector<1x128xf32> to vector<8x128xf32>
      %113 = arith.addf %110, %112 : vector<8x128xf32>
      %cst_77 = arith.constant 0.000000e+00 : f32
      %114 = vector.broadcast %cst_77 : f32 to vector<8x128xf32>
      %115 = arith.maximumf %113, %114 : vector<8x128xf32>
      %c0_78 = arith.constant 0 : index
      %c0_79 = arith.constant 0 : index
      %116 = vector.load %arg19[%c0_78, %c0_79] : memref<128x128xf32, #tpu.memory_space<vmem>>, vector<128x128xf32>
      %cst_80 = arith.constant dense<0.000000e+00> : vector<8x128xf32>
      %117 = tpu.matmul %115, %116, %cst_80 {dimension_numbers = #tpu.dot_dimension_numbers<[1], [0], [0], [1], [0, 0, 1, 1], [], []>} : vector<8x128xf32>, vector<128x128xf32>, vector<8x128xf32> -> vector<8x128xf32>
      %c0_81 = arith.constant 0 : index
      %c0_82 = arith.constant 0 : index
      %118 = vector.load %arg20[%c0_81, %c0_82] : memref<1x128xf32, #tpu.memory_space<vmem>>, vector<1x128xf32>
      %119 = vector.broadcast %118 : vector<1x128xf32> to vector<8x128xf32>
      %120 = arith.addf %117, %119 : vector<8x128xf32>
      %c0_83 = arith.constant 0 : index
      %c0_84 = arith.constant 0 : index
      %121 = vector.load %arg21[%c0_83, %c0_84] : memref<8x128xf32, #tpu.memory_space<vmem>>, vector<8x128xf32>
      tpu.vector_store %arg21[%c0_83, %c0_84], %120 {strides = array<i32>} : memref<8x128xf32, #tpu.memory_space<vmem>>, vector<8x128xf32>,
    } else {
    }
    return
  }
  func.func @transform_0(%arg0: i32) -> (i32, i32) {
    %c0_i32 = arith.constant 0 : i32
    %c0_i32_0 = arith.constant 0 : i32
    return %arg0, %c0_i32 : i32, i32
  }
  func.func @transform_1(%arg0: i32) -> (i32, i32) {
    %c0_i32 = arith.constant 0 : i32
    %c0_i32_0 = arith.constant 0 : i32
    return %arg0, %c0_i32 : i32, i32
  }
  func.func @transform_2(%arg0: i32) -> (i32, i32, i32) {
    %c0_i32 = arith.constant 0 : i32
    %c0_i32_0 = arith.constant 0 : i32
    %c0_i32_1 = arith.constant 0 : i32
    return %arg0, %c0_i32, %c0_i32_0 : i32, i32, i32
  }
  func.func @transform_3(%arg0: i32) -> (i32, i32, i32) {
    %c0_i32 = arith.constant 0 : i32
    %c0_i32_0 = arith.constant 0 : i32
    %c0_i32_1 = arith.constant 0 : i32
    return %arg0, %c0_i32, %c0_i32_0 : i32, i32, i32
  }
  func.func @transform_4(%arg0: i32) -> (i32, i32, i32) {
    %c0_i32 = arith.constant 0 : i32
    %c0_i32_0 = arith.constant 0 : i32
    %c0_i32_1 = arith.constant 0 : i32
    return %arg0, %c0_i32, %c0_i32_0 : i32, i32, i32
  }
  func.func @transform_5(%arg0: i32) -> (i32, i32) {
    %c0_i32 = arith.constant 0 : i32
    %c0_i32_0 = arith.constant 0 : i32
    %c0_i32_1 = arith.constant 0 : i32
    return %c0_i32, %c0_i32_0 : i32, i32
  }
  func.func @transform_6(%arg0: i32) -> (i32, i32) {
    %c0_i32 = arith.constant 0 : i32
    %c0_i32_0 = arith.constant 0 : i32
    %c0_i32_1 = arith.constant 0 : i32
    return %c0_i32, %c0_i32_0 : i32, i32
  }
  func.func @transform_7(%arg0: i32) -> (i32, i32) {
    %c0_i32 = arith.constant 0 : i32
    %c0_i32_0 = arith.constant 0 : i32
    %c0_i32_1 = arith.constant 0 : i32
    return %c0_i32, %c0_i32_0 : i32, i32
  }
  func.func @transform_8(%arg0: i32) -> (i32, i32) {
    %c0_i32 = arith.constant 0 : i32
    %c0_i32_0 = arith.constant 0 : i32
    %c0_i32_1 = arith.constant 0 : i32
    return %c0_i32, %c0_i32_0 : i32, i32
  }
  func.func @transform_9(%arg0: i32) -> (i32, i32) {
    %c0_i32 = arith.constant 0 : i32
    %c0_i32_0 = arith.constant 0 : i32
    %c0_i32_1 = arith.constant 0 : i32
    return %c0_i32, %c0_i32_0 : i32, i32
  }
  func.func @transform_10(%arg0: i32) -> (i32, i32) {
    %c0_i32 = arith.constant 0 : i32
    %c0_i32_0 = arith.constant 0 : i32
    %c0_i32_1 = arith.constant 0 : i32
    return %c0_i32, %c0_i32_0 : i32, i32
  }
  func.func @transform_11(%arg0: i32) -> (i32, i32) {
    %c0_i32 = arith.constant 0 : i32
    %c0_i32_0 = arith.constant 0 : i32
    %c0_i32_1 = arith.constant 0 : i32
    return %c0_i32, %c0_i32_0 : i32, i32
  }
  func.func @transform_12(%arg0: i32) -> (i32, i32) {
    %c0_i32 = arith.constant 0 : i32
    %c0_i32_0 = arith.constant 0 : i32
    %c0_i32_1 = arith.constant 0 : i32
    return %c0_i32, %c0_i32_0 : i32, i32
  }
  func.func @transform_13(%arg0: i32) -> (i32, i32) {
    %c0_i32 = arith.constant 0 : i32
    %c0_i32_0 = arith.constant 0 : i32
    %c0_i32_1 = arith.constant 0 : i32
    return %c0_i32, %c0_i32_0 : i32, i32
  }
  func.func @transform_14(%arg0: i32) -> (i32, i32) {
    %c0_i32 = arith.constant 0 : i32
    %c0_i32_0 = arith.constant 0 : i32
    %c0_i32_1 = arith.constant 0 : i32
    return %c0_i32, %c0_i32_0 : i32, i32
  }
  func.func @transform_15(%arg0: i32) -> (i32, i32) {
    %c0_i32 = arith.constant 0 : i32
    %c0_i32_0 = arith.constant 0 : i32
    %c0_i32_1 = arith.constant 0 : i32
    return %c0_i32, %c0_i32_0 : i32, i32
  }
  func.func @transform_16(%arg0: i32) -> (i32, i32) {
    %c0_i32 = arith.constant 0 : i32
    %c0_i32_0 = arith.constant 0 : i32
    %c0_i32_1 = arith.constant 0 : i32
    return %c0_i32, %c0_i32_0 : i32, i32
  }
  func.func @transform_17(%arg0: i32) -> (i32, i32) {
    %c0_i32 = arith.constant 0 : i32
    %c0_i32_0 = arith.constant 0 : i32
    %c0_i32_1 = arith.constant 0 : i32
    return %c0_i32, %c0_i32_0 : i32, i32
  }
  func.func @transform_18(%arg0: i32) -> (i32, i32) {
    %c0_i32 = arith.constant 0 : i32
    %c0_i32_0 = arith.constant 0 : i32
    %c0_i32_1 = arith.constant 0 : i32
    return %c0_i32, %c0_i32_0 : i32, i32
  }
  func.func @transform_19(%arg0: i32) -> (i32, i32) {
    %c0_i32 = arith.constant 0 : i32
    %c0_i32_0 = arith.constant 0 : i32
    %c0_i32_1 = arith.constant 0 : i32
    return %c0_i32, %c0_i32_0 : i32, i32
  }
  func.func @transform_20(%arg0: i32) -> (i32, i32) {
    %c0_i32 = arith.constant 0 : i32
    %c0_i32_0 = arith.constant 0 : i32
    %c0_i32_1 = arith.constant 0 : i32
    return %c0_i32, %c0_i32_0 : i32, i32
  }
  func.func @transform_21(%arg0: i32) -> (i32, i32) {
    %c0_i32 = arith.constant 0 : i32
    %c0_i32_0 = arith.constant 0 : i32
    %c0_i32_1 = arith.constant 0 : i32
    return %c0_i32, %c0_i32_0 : i32, i32
  }
}

</mosaic_0001>

<bundles_post_ra>
// kernel: tpu_custom_call.1
= control target key start
LH: loop header
LB: loop body
LE: loop exit
PB: predicated region body
PF: predicated region fallthrough
CT: control target
= control target key end

     0   :  { %s4351_s0 = inlined_call_operand.hbm [shape: f32[24,64], index: 0, kind: input, shape index: {}]   ;;  %s4352_s1 = inlined_call_operand.hbm [shape: f32[24,64], index: 1, kind: input, shape index: {}]   ;;  %s4353_s2 = inlined_call_operand.hbm [shape: f32[3,8,128], index: 2, kind: input, shape index: {}]   ;;  %s4354_s3 = inlined_call_operand.hbm [shape: f32[3,8,8], index: 3, kind: input, shape index: {}]   ;;  %s4355_s4 = inlined_call_operand.hbm [shape: f32[3,8,8], index: 4, kind: input, shape index: {}]   ;;  %s4356_s5 = inlined_call_operand.vmem [shape: f32[8,128], index: 5, kind: input, shape index: {}]   ;;  %s4357_s6 = inlined_call_operand.hbm [shape: f32[64,128], index: 6, kind: input, shape index: {}]   ;;  %s4358_s7 = inlined_call_operand.vmem [shape: f32[1,128], index: 7, kind: input, shape index: {}]   ;;  %s4359_s8 = inlined_call_operand.hbm [shape: f32[64,128], index: 8, kind: input, shape index: {}]   ;;  %s4360_s9 = inlined_call_operand.vmem [shape: f32[1,128], index: 9, kind: input, shape index: {}]   ;;  %s4361_s10 = inlined_call_operand.hbm [shape: f32[256,256], index: 10, kind: input, shape index: {}]   ;;  %s4362_s11 = inlined_call_operand.vmem [shape: f32[1,256], index: 11, kind: input, shape index: {}]   ;;  %s4363_s12 = inlined_call_operand.hbm [shape: f32[256,384], index: 12, kind: input, shape index: {}]   ;;  %s4364_s13 = inlined_call_operand.vmem [shape: f32[1,384], index: 13, kind: input, shape index: {}]   ;;  %s4365_s14 = inlined_call_operand.hbm [shape: f32[256,128], index: 14, kind: input, shape index: {}]   ;;  %s4366_s15 = inlined_call_operand.vmem [shape: f32[1,128], index: 15, kind: input, shape index: {}]   ;;  %s4367_s16 = inlined_call_operand.hbm [shape: f32[128,128], index: 16, kind: input, shape index: {}]   ;;  %s4368_s17 = inlined_call_operand.vmem [shape: f32[1,128], index: 17, kind: input, shape index: {}]   ;;  %s4369_s18 = inlined_call_operand.hbm [shape: f32[128,128], index: 18, kind: input, shape index: {}]   ;;  %s4370_s19 = inlined_call_operand.vmem [shape: f32[1,128], index: 19, kind: input, shape index: {}]   ;;  %s4371_s20 = inlined_call_operand.hbm [shape: f32[8,128], index: 20, kind: output, shape index: {0}]   ;;  %s4372_s21 = inlined_call_operand.hbm [shape: f32[8,128], index: 21, kind: output, shape index: {1}]  }
   0x1   :  { %4395 = sst [smem:[#allocation38_spill]] %s4351_s0 }
   0x2   :  { %4396 = sst [smem:[#allocation39_spill]] %s4352_s1 }
   0x3   :  { %4397 = sst [smem:[#allocation40_spill]] %s4353_s2 }
   0x4   :  { %4398 = sst [smem:[#allocation41_spill]] %s4354_s3 }
   0x5   :  { %4399 = sst [smem:[#allocation42_spill]] %s4355_s4 }
   0x6   :  { %4400 = sst [smem:[#allocation43_spill]] %s4356_s5 }
   0x7   :  { %4401 = sst [smem:[#allocation44_spill]] %s4357_s6 }
   0x8   :  { %4402 = sst [smem:[#allocation45_spill]] %s4359_s8 }
   0x9   :  { %4403 = sst [smem:[#allocation46_spill]] %s4360_s9 }
   0xa   :  { %4404 = sst [smem:[#allocation47_spill]] %s4361_s10 }
   0xb   :  { %4405 = sst [smem:[#allocation48_spill]] %s4362_s11 }
   0xc   :  { %4406 = sst [smem:[#allocation49_spill]] %s4363_s12 }
   0xd   :  { %4407 = sst [smem:[#allocation50_spill]] %s4364_s13 }
   0xe   :  { %4408 = sst [smem:[#allocation51_spill]] %s4365_s14 }
   0xf   :  { %4409 = sst [smem:[#allocation52_spill]] %s4366_s15 }
  0x10   :  { %4410 = sst [smem:[#allocation53_spill]] %s4367_s16 }
  0x11   :  { %4411 = sst [smem:[#allocation54_spill]] %s4368_s17 }
  0x12   :  { %4412 = sst [smem:[#allocation55_spill]] %s4370_s19 }
  0x13   :  { %4413 = sst [smem:[#allocation56_spill]] %s4371_s20 }
  0x14   :  { %4414 = sst [smem:[#allocation57_spill]] %s4372_s21 }
  0x15   :  { %27 = vsyncpa [#allocation5], 0 }
  0x16   :  { %29 = vsyncpa [#allocation5 + $0x1], 0 }
  0x17   :  { %30 = vsyncpa [#allocation8], 0 }
  0x18   :  { %32 = vsyncpa [#allocation8 + $0x1], 0 }
  0x19   :  { %33 = vsyncpa [#allocation11], 0 }
  0x1a   :  { %35 = vsyncpa [#allocation11 + $0x1], 0 }
  0x1b   :  { %36 = vsyncpa [#allocation14], 0 }
  0x1c   :  { %37 = vsyncpa [#allocation17], 0 }
  0x1d   :  { %38 = vsyncpa [#allocation20], 0 }
  0x1e   :  { %39 = vsyncpa [#allocation23], 0 }
  0x1f   :  { %40 = vsyncpa [#allocation6], 0 }
  0x20   :  { %41 = vsyncpa [#allocation26], 0  ;;  %s3795_s2 = smov 0   ;;  %s3797_s25 = smov 0  }
  0x21   :  { %s3799_s26 = smov 0   ;;  %s3801_s27 = smov 0  }
  0x22 LB: > { %s3660_s3 = smov [#allocation13]   ;;  %s3816_s29 = sadd.s32 4294967295, %s3658_s27   ;;  %s3658_s27 = sphi %s3801_s27, %s4461_s27   ;;  %s3654_s26 = sphi %s3799_s26, %s4465_s26   ;;  %s3650_s25 = sphi %s3797_s25, %s4464_s25   ;;  %s3646_s2 = sphi %s3795_s2, %s4463_s2  }
  0x23   : > { %s554_s28 = sshll.u32 %s3660_s3, 4  ;;  %p2582_p0 = scmp.ge.s32.totalorder %s3658_s27, 1  ;;  %s555_s28 = int_to_ptr.vmem [resolvable:$true] %s554_s28 }
  0x24   : > { %p4386_p1 = scmp.eq.s32.totalorder %s3816_s29, 0  ;;  %p539_p2 = scmp.lt.s32.totalorder %s3658_s27, 4 }
  0x25   : > { %s3661_s4 = smov [#allocation16]   ;;  %s3662_s22 = smov [#allocation19]  }
  0x26   : > { %p3822_p4 = pnand %p2582_p0, %p539_p2  ;;  %s586_s30 = sshll.u32 %s3661_s4, 4  ;;  %s3834_s30 = int_to_ptr.vmem [resolvable:$true] %s586_s30 }
  0x27   : > { %s3836_s23 = sshll.u32 %s3662_s22, 4  ;;  %s3233_s24 = scalar_lea.vmem %s555_s28, 1024  ;;  %s619_s23 = int_to_ptr.vmem [resolvable:$true] %s3836_s23 }
  0x28   : > { %s4415_s0 = scalar_select %p3822_p4, 1, 0 }
  0x29   : > { %p3091_p5 = pneg %p3822_p4  ;;  %p3234_p8 = scmp.ne.s32.totalorder %s555_s28, %s3233_s24 }
  0x2a   : > { %p3241_p11 = scmp.lt.s32.totalorder %s555_s28, %s555_s28  ;;  %p3242_p12 = scmp.lt.s32.totalorder %s3233_s24, %s3233_s24 }
  0x2b   : > { %p3830_p6 = pnand %p3091_p5, %p4386_p1 }
  0x2c   : > { %p3243_p13 = por %p3242_p12, %p3241_p11 }
  0x2d   : > { %s4416_s5 = scalar_select %p3830_p6, 1, 0 }
  0x2e   : > { %p3840_p7 = pneg %p3830_p6 }
  0x30   : > { %s4417_s1 = scalar_select %p3840_p7, 1, 0 }
  0x31   : > { %p3236_p9 = pnand %p3234_p8, %p3840_p7 }
  0x33   : > { %p3237_p10 = pneg %p3236_p9 }
  0x35   : > { %p3244_p0 = pnand %p3243_p13, %p3237_p10 }
  0x37   : > { %3247 = shalt.err (!%p3244_p0)
}
  0x38   : > { %s4378_s3 = smov 128   ;;  %s4380_s4 = smov 8  }
  0x39   : > { %s4418_s6 = sld [smem:[#allocation44_spill]]  ;;  %s3259_s20 = scalar_lea.vmem %s3834_s30, 8192 }
  0x3a   : > { %p3260_p2 = scmp.ne.s32.totalorder %s3834_s30, %s3259_s20  ;;  %p3267_p9 = scmp.lt.s32.totalorder %s3834_s30, %s3834_s30 }
  0x3b   : > { %p3268_p10 = scmp.lt.s32.totalorder %s3259_s20, %s3259_s20 }
  0x3c   : > { %p3262_p5 = pnand %p3260_p2, %p3840_p7 }
  0x3d   : > { %p3269_p11 = por %p3268_p10, %p3267_p9 }
  0x3e   : > { %p3263_p8 = pneg %p3262_p5 }
  0x3f   : > { %3094 = dma.hbm_to_vmem [thread:$0]  (!%p3830_p6), %s4418_s6, 1024, %s555_s28, [#allocation14], %s4378_s3, %s4378_s3, %s4380_s4  }
  0x40   : > { %p3270_p12 = pnand %p3269_p11, %p3263_p8 }
  0x42   : > { %3273 = shalt.err (!%p3270_p12)
}
  0x43   : > { %s3665_s24 = smov 256   ;;  %s3666_s19 = smov 16  }
  0x44   : > { %s4419_s10 = sld [smem:[#allocation47_spill]]  ;;  %s3285_s22 = scalar_lea.vmem %s619_s23, 4096 }
  0x45   : > { %p3286_p13 = scmp.ne.s32.totalorder %s619_s23, %s3285_s22  ;;  %p3293_p5 = scmp.lt.s32.totalorder %s619_s23, %s619_s23 }
  0x46   : > { %p3294_p8 = scmp.lt.s32.totalorder %s3285_s22, %s3285_s22 }
  0x47   : > { %p3288_p0 = pnand %p3286_p13, %p3840_p7 }
  0x48   : > { %p3295_p9 = por %p3294_p8, %p3293_p5 }
  0x49   : > { %p3289_p2 = pneg %p3288_p0 }
  0x4a   : > { %3100 = dma.hbm_to_vmem [thread:$0]  (!%p3830_p6), %s4419_s10, 8192, %s3834_s30, [#allocation17], %s3665_s24, %s3665_s24, %s3666_s19  }
  0x4b   : > { %p3296_p10 = pnand %p3295_p9, %p3289_p2 }
  0x4d   : > { %3299 = shalt.err (!%p3296_p10)
}
  0x4e   : > { %s4420_s14 = sld [smem:[#allocation51_spill]]  ;;  %s3878_s19 = sadd.s32 1, %s3658_s27  }
  0x4f   : > { %4421 = sst [smem:[#allocation36_spill]] %s3878_s19  ;;  %s51_s6 = ssub.s32 %s3658_s27, %s3878_s19 }
  0x50   : > { %s54_s30 = sadd.s32 1, %s3654_s26  ;;  %p52_p11 = scmp.eq.s32.totalorder %s51_s6, 0 }
  0x51   : > { %p61_p12 = scmp.ne.s32.totalorder %s3654_s26, %s3650_s25  ;;  %p62_p13 = scmp.eq.s32.totalorder %s3658_s27, 0 }
  0x52   : > { %p67_p0 = scmp.ne.s32.totalorder %s3650_s25, %s3646_s2  ;;  %p3136_p8 = scmp.lt.s32.totalorder %s3658_s27, 3 }
  0x53   : > { %s3889_s24 = scalar_select %p52_p11, %s3654_s26, %s54_s30  }
  0x54   : > { %3106 = dma.hbm_to_vmem [thread:$0]  (!%p3830_p6), %s4420_s14, 4096, %s619_s23, [#allocation20], %s4378_s3, %s4378_s3, %s4380_s4  }
  0x55   : > { %4422 = sst [smem:[#allocation37_spill]] %s3889_s24  ;;  %p63_p2 = por %p62_p13, %p61_p12 }
  0x56   : > { %p3893_p5 = por %p4386_p1, %p67_p0  ;;  %s4382_s23 = sand.u32 1, %s3654_s26  }
  0x57   : > { %s3901_s28 = sshll.u32 %s4382_s23, 3  ;;  %s3904_s22 = sshll.u32 %s3658_s27, 7 }
  0x58   : > { %s4423_s21 = scalar_select %p3893_p5, 1, 0 }
  0x59   : > { %p3906_p9 = pnand %p3136_p8, %p63_p2  ;;  %s4385_s2 = sand.u32 1, %s3658_s27  }
  0x5a   : > { %s4425_s3 = sld [smem:[#allocation39_spill]]  ;;  %s689_s23 = scalar_lea.vmem [#allocation7], %s3901_s28 }
  0x5b   : > { %s696_s10 = sshll.u32 %s689_s23, 4  ;;  %s3920_s14 = scalar_lea.sflag [#allocation8], %s4385_s2  ;;  %s697_s10 = int_to_ptr.vmem [resolvable:$true] %s696_s10 }
  0x5c   : > { %p3926_p11 = pneg %p3906_p9 }
  0x60   : > { %s3915_s4 = scalar_lea.hbm %s4425_s3, %s3904_s22  ;;  %s3305_s17 = scalar_lea.hbm %s4425_s3, 384 }
  0x61   : > { %s3300_s24 = scalar_lea.hbm %s3915_s4, 128  ;;  %p3306_p0 = scmp.lt.s32.totalorder %s3915_s4, %s4425_s3 }
  0x62   : > { %p3301_p10 = scmp.ne.s32.totalorder %s3915_s4, %s3300_s24  ;;  %p3307_p2 = scmp.lt.s32.totalorder %s3305_s17, %s3300_s24 }
  0x64   : > { %p3303_p12 = pnand %p3926_p11, %p3301_p10  ;;  %p3308_p8 = por %p3307_p2, %p3306_p0 }
  0x66   : > { %p3304_p13 = pneg %p3303_p12 }
  0x68   : > { %p3309_p3 = pnand %p3308_p8, %p3304_p13 }
  0x6a   : > { %3312 = shalt.err (!%p3309_p3)
}
  0x6b   : > { %s3313_s2 = scalar_lea.vmem %s697_s10, 128  ;;  %s3667_s15 = smov [#allocation7]  }
  0x6c   : > { %p3314_p1 = scmp.ne.s32.totalorder %s697_s10, %s3313_s2  ;;  %s3318_s11 = sshll.u32 %s3667_s15, 4  ;;  %s3319_s11 = int_to_ptr.vmem [resolvable:$false] %s3318_s11 }
  0x6d   : > { %s3320_s9 = scalar_lea.vmem %s3319_s11, 256  ;;  %p3321_p10 = scmp.lt.s32.totalorder %s697_s10, %s3319_s11 }
  0x6e   : > { %p3316_p5 = pnand %p3314_p1, %p3926_p11  ;;  %p3322_p12 = scmp.lt.s32.totalorder %s3320_s9, %s3313_s2 }
  0x70   : > { %p3317_p4 = pneg %p3316_p5  ;;  %p3323_p6 = por %p3322_p12, %p3321_p10 }
  0x72   : > { %p3324_p7 = pnand %p3323_p6, %p3317_p4 }
  0x74   : > { %3327 = shalt.err (!%p3324_p7)
}
  0x75   : > { %3119 = dma.hbm_to_vmem [thread:$0]  (!%p3906_p9), %s3915_s4, 128, %s697_s10, %s3920_s14  }
  0x76   : > { %s4427_s24 = sld [smem:[#allocation41_spill]]  ;;  %s725_s9 = scalar_lea.vmem [#allocation10], %s3901_s28 }
  0x77   : > { %s732_s11 = sshll.u32 %s725_s9, 4  ;;  %s4428_s2 = sand.u32 1, %s3658_s27   ;;  %s733_s11 = int_to_ptr.vmem [resolvable:$true] %s732_s11 }
  0x78   : > { %s3954_s6 = scalar_lea.sflag [#allocation11], %s4428_s2 }
  0x7c   : > { %s3949_s15 = scalar_lea.hbm %s4427_s24, %s3904_s22  ;;  %s3333_s23 = scalar_lea.hbm %s4427_s24, 384 }
  0x7d   : > { %s3328_s30 = scalar_lea.hbm %s3949_s15, 128  ;;  %p3334_p6 = scmp.lt.s32.totalorder %s3949_s15, %s4427_s24 }
  0x7e   : > { %p3329_p1 = scmp.ne.s32.totalorder %s3949_s15, %s3328_s30  ;;  %p3335_p7 = scmp.lt.s32.totalorder %s3333_s23, %s3328_s30 }
  0x80   : > { %p3331_p3 = pnand %p3329_p1, %p3926_p11  ;;  %p3336_p5 = por %p3335_p7, %p3334_p6 }
  0x82   : > { %p3332_p4 = pneg %p3331_p3 }
  0x84   : > { %p3337_p13 = pnand %p3336_p5, %p3332_p4 }
  0x86   : > { %3340 = shalt.err (!%p3337_p13)
}
  0x87   : > { %s3341_s27 = scalar_lea.vmem %s733_s11, 128  ;;  %s3668_s9 = smov [#allocation10]  }
  0x88   : > { %p3342_p0 = scmp.ne.s32.totalorder %s733_s11, %s3341_s27  ;;  %s3346_s2 = sshll.u32 %s3668_s9, 4  ;;  %s3347_s2 = int_to_ptr.vmem [resolvable:$false] %s3346_s2 }
  0x89   : > { %s3348_s3 = scalar_lea.vmem %s3347_s2, 256  ;;  %p3349_p10 = scmp.lt.s32.totalorder %s733_s11, %s3347_s2 }
  0x8a   : > { %p3344_p2 = pnand %p3342_p0, %p3926_p11  ;;  %p3350_p12 = scmp.lt.s32.totalorder %s3348_s3, %s3341_s27 }
  0x8c   : > { %p3345_p8 = pneg %p3344_p2  ;;  %p3351_p1 = por %p3350_p12, %p3349_p10 }
  0x8e   : > { %p3352_p3 = pnand %p3351_p1, %p3345_p8 }
  0x90   : > { %3355 = shalt.err (!%p3352_p3)
}
  0x91   : > { %3125 = dma.hbm_to_vmem [thread:$0]  (!%p3906_p9), %s3949_s15, 128, %s733_s11, %s3954_s6  }
  0x92   : > { %s3669_s30 = smov [#allocation15]   ;;  %s3670_s4 = smov [#allocation18]  }
  0x93   : > { %s570_s10 = sshll.u32 %s3669_s30, 4  ;;  %s602_s23 = sshll.u32 %s3670_s4, 4  ;;  %s571_s10 = int_to_ptr.vmem [resolvable:$true] %s570_s10  ;;  %s603_s23 = int_to_ptr.vmem [resolvable:$true] %s602_s23 }
  0x94   : > { %s3367_s13 = scalar_lea.vmem %s571_s10, 1024  ;;  %p4429_p6 = scmp.ne.s32.totalorder %s4417_s1, 0 }
  0x95   : > { %p3368_p4 = scmp.ne.s32.totalorder %s571_s10, %s3367_s13  ;;  %p3375_p13 = scmp.lt.s32.totalorder %s571_s10, %s571_s10 }
  0x96   : > { %p3376_p0 = scmp.lt.s32.totalorder %s3367_s13, %s3367_s13 }
  0x97   : > { %p3370_p7 = pnand %p3368_p4, %p4429_p6 }
  0x98   : > { %p3377_p2 = por %p3376_p0, %p3375_p13 }
  0x99   : > { %p3371_p5 = pneg %p3370_p7 }
  0x9b   : > { %p3378_p8 = pnand %p3377_p2, %p3371_p5 }
  0x9d   : > { %3381 = shalt.err (!%p3378_p8)
}
  0x9e   : > { %p4430_p10 = scmp.ne.s32.totalorder %s4416_s5, 0  ;;  %s4431_s3 = smov 8  }
  0x9f   : > { %s4432_s17 = smov 128   ;;  %s4433_s8 = sld [smem:[#allocation45_spill]] }
  0xa0   : > { %s3393_s27 = scalar_lea.vmem %s603_s23, 12288  ;;  %p3401_p4 = scmp.lt.s32.totalorder %s603_s23, %s603_s23 }
  0xa1   : > { %p3394_p12 = scmp.ne.s32.totalorder %s603_s23, %s3393_s27  ;;  %p3402_p7 = scmp.lt.s32.totalorder %s3393_s27, %s3393_s27 }
  0xa3   : > { %p3396_p1 = pnand %p3394_p12, %p4429_p6  ;;  %p3403_p5 = por %p3402_p7, %p3401_p4 }
  0xa5   : > { %3097 = dma.hbm_to_vmem [thread:$0]  (!%p4430_p10), %s4433_s8, 1024, %s571_s10, [#allocation14], %s4432_s17, %s4432_s17, %s4431_s3  }
  0xa6   : > { %p3397_p3 = pneg %p3396_p1 }
  0xa8   : > { %p3404_p13 = pnand %p3403_p5, %p3397_p3 }
  0xaa   : > { %3407 = shalt.err (!%p3404_p13)
}
  0xab   : > { %s3671_s9 = smov 384   ;;  %s3672_s2 = smov 24  }
  0xac   : > { %s4434_s12 = sld [smem:[#allocation49_spill]]  ;;  %s3673_s10 = smov [#allocation21]  }
  0xad   : > { %s634_s13 = sshll.u32 %s3673_s10, 4  ;;  %s3674_s15 = smov [#allocation22]   ;;  %s635_s13 = int_to_ptr.vmem [resolvable:$true] %s634_s13 }
  0xae   : > { %s650_s11 = sshll.u32 %s3674_s15, 4  ;;  %s3419_s8 = scalar_lea.vmem %s635_s13, 2048  ;;  %s651_s11 = int_to_ptr.vmem [resolvable:$true] %s650_s11 }
  0xaf   : > { %p3420_p0 = scmp.ne.s32.totalorder %s635_s13, %s3419_s8  ;;  %p3427_p12 = scmp.lt.s32.totalorder %s635_s13, %s635_s13 }
  0xb0   : > { %p3428_p1 = scmp.lt.s32.totalorder %s3419_s8, %s3419_s8 }
  0xb1   : > { %p3422_p2 = pnand %p3420_p0, %p4429_p6 }
  0xb2   : > { %3103 = dma.hbm_to_vmem [thread:$0]  (!%p4430_p10), %s4434_s12, 12288, %s603_s23, [#allocation17], %s3671_s9, %s3671_s9, %s3672_s2  }
  0xb3   : > { %p3423_p8 = pneg %p3422_p2  ;;  %p3429_p3 = por %p3428_p1, %p3427_p12 }
  0xb5   : > { %p3430_p4 = pnand %p3429_p3, %p3423_p8 }
  0xb7   : > { %3433 = shalt.err (!%p3430_p4)
}
  0xb8   : > { %s4435_s16 = sld [smem:[#allocation53_spill]]  ;;  %s3445_s9 = scalar_lea.vmem %s651_s11, 2048 }
  0xb9   : > { %p3446_p7 = scmp.ne.s32.totalorder %s651_s11, %s3445_s9  ;;  %p3453_p0 = scmp.lt.s32.totalorder %s651_s11, %s651_s11 }
  0xba   : > { %p3454_p2 = scmp.lt.s32.totalorder %s3445_s9, %s3445_s9 }
  0xbb   : > { %p3448_p5 = pnand %p3446_p7, %p4429_p6 }
  0xbc   : > { %p3455_p8 = por %p3454_p2, %p3453_p0 }
  0xbd   : > { %p3449_p13 = pneg %p3448_p5 }
  0xbe   : > { %3109 = dma.hbm_to_vmem [thread:$0]  (!%p4430_p10), %s4435_s16, 2048, %s635_s13, [#allocation20], %s4432_s17, %s4432_s17, %s4431_s3  }
  0xbf   : > { %p3456_p12 = pnand %p3455_p8, %p3449_p13 }
  0xc1   : > { %3459 = shalt.err (!%p3456_p12)
}
  0xc2   : > { %3112 = dma.hbm_to_vmem [thread:$0]  (!%p4430_p10), %s4369_s18, 2048, %s651_s11, [#allocation23], %s4432_s17, %s4432_s17, %s4431_s3  }
  0xc3   : > { %s4436_s4 = sld [smem:[#allocation38_spill]]  ;;  %s671_s5 = scalar_lea.vmem [#allocation4], %s3901_s28 }
  0xc4   : > { %s678_s13 = sshll.u32 %s671_s5, 4  ;;  %s4437_s27 = sld [smem:[#allocation40_spill]]  ;;  %s679_s13 = int_to_ptr.vmem [resolvable:$true] %s678_s13 }
  0xc5   : > { %s4439_s2 = sand.u32 1, %s3654_s26  }
  0xc6   : > { %s668_s12 = scalar_lea.sflag [#allocation5], %s4439_s2 }
  0xc9   : > { %s4014_s10 = scalar_lea.hbm %s4436_s4, %s3904_s22  ;;  %s3465_s11 = scalar_lea.hbm %s4436_s4, 384 }
  0xca   : > { %s4438_s9 = smov %s4437_s27  ;;  %s4021_s8 = scalar_lea.hbm %s4437_s27, %s3904_s22 }
  0xcb   : > { %s3460_s16 = scalar_lea.hbm %s4014_s10, 128  ;;  %p3466_p3 = scmp.lt.s32.totalorder %s4014_s10, %s4436_s4 }
  0xcc   : > { %p3461_p6 = scmp.ne.s32.totalorder %s4014_s10, %s3460_s16  ;;  %p3467_p4 = scmp.lt.s32.totalorder %s3465_s11, %s3460_s16 }
  0xce   : > { %p3463_p10 = pnand %p3461_p6, %p3926_p11  ;;  %p3468_p7 = por %p3467_p4, %p3466_p3 }
  0xd0   : > { %p3464_p1 = pneg %p3463_p10 }
  0xd2   : > { %p3469_p5 = pnand %p3468_p7, %p3464_p1 }
  0xd4   : > { %3472 = shalt.err (!%p3469_p5)
}
  0xd5   : > { %s3473_s5 = scalar_lea.vmem %s679_s13, 128  ;;  %s3675_s15 = smov [#allocation4]  }
  0xd6   : > { %p3474_p13 = scmp.ne.s32.totalorder %s679_s13, %s3473_s5  ;;  %s3478_s23 = sshll.u32 %s3675_s15, 4  ;;  %s3479_s23 = int_to_ptr.vmem [resolvable:$false] %s3478_s23 }
  0xd7   : > { %s3480_s27 = scalar_lea.vmem %s3479_s23, 256  ;;  %p3481_p8 = scmp.lt.s32.totalorder %s679_s13, %s3479_s23 }
  0xd8   : > { %p3476_p0 = pnand %p3474_p13, %p3926_p11  ;;  %p3482_p12 = scmp.lt.s32.totalorder %s3480_s27, %s3473_s5 }
  0xda   : > { %p3477_p2 = pneg %p3476_p0  ;;  %p3483_p6 = por %p3482_p12, %p3481_p8 }
  0xdc   : > { %p3484_p10 = pnand %p3483_p6, %p3477_p2 }
  0xde   : > { %3487 = shalt.err (!%p3484_p10)
}
  0xdf   : > { %3116 = dma.hbm_to_vmem [thread:$0]  (!%p3906_p9), %s4014_s10, 128, %s679_s13, %s668_s12  }
  0xe0   : > { %s707_s16 = scalar_lea.vmem [#allocation9], %s3901_s28  ;;  %s4440_s11 = sld [smem:[#allocation42_spill]] }
  0xe1   : > { %s714_s2 = sshll.u32 %s707_s16, 4  ;;  %s3488_s30 = scalar_lea.hbm %s4021_s8, 128  ;;  %s715_s2 = int_to_ptr.vmem [resolvable:$true] %s714_s2 }
  0xe2   : > { %p3489_p1 = scmp.ne.s32.totalorder %s4021_s8, %s3488_s30  ;;  %s3493_s23 = scalar_lea.hbm %s4438_s9, 384 }
  0xe3   : > { %p3494_p7 = scmp.lt.s32.totalorder %s4021_s8, %s4438_s9  ;;  %p3495_p5 = scmp.lt.s32.totalorder %s3493_s23, %s3488_s30 }
  0xe4   : > { %p3491_p3 = pnand %p3489_p1, %p3926_p11 }
  0xe5   : > { %p3496_p13 = por %p3495_p5, %p3494_p7 }
  0xe6   : > { %s4046_s1 = scalar_lea.hbm %s4440_s11, %s3904_s22  ;;  %p3492_p4 = pneg %p3491_p3 }
  0xe8   : > { %p3497_p0 = pnand %p3496_p13, %p3492_p4 }
  0xea   : > { %3500 = shalt.err (!%p3497_p0)
}
  0xeb   : > { %s3501_s12 = scalar_lea.vmem %s715_s2, 128  ;;  %s3676_s22 = smov [#allocation9]  }
  0xec   : > { %p3502_p2 = scmp.ne.s32.totalorder %s715_s2, %s3501_s12  ;;  %s3506_s10 = sshll.u32 %s3676_s22, 4  ;;  %s3507_s10 = int_to_ptr.vmem [resolvable:$false] %s3506_s10 }
  0xed   : > { %s3508_s13 = scalar_lea.vmem %s3507_s10, 256  ;;  %p3509_p6 = scmp.lt.s32.totalorder %s715_s2, %s3507_s10 }
  0xee   : > { %p3504_p8 = pnand %p3502_p2, %p3926_p11  ;;  %p3510_p10 = scmp.lt.s32.totalorder %s3508_s13, %s3501_s12 }
  0xf0   : > { %p3505_p12 = pneg %p3504_p8  ;;  %p3511_p1 = por %p3510_p10, %p3509_p6 }
  0xf2   : > { %p3512_p3 = pnand %p3511_p1, %p3505_p12 }
  0xf4   : > { %3515 = shalt.err (!%p3512_p3)
}
  0xf5   : > { %3122 = dma.hbm_to_vmem [thread:$0]  (!%p3906_p9), %s4021_s8, 128, %s715_s2, %s3920_s14  }
  0xf6   : > { %s743_s4 = scalar_lea.vmem [#allocation12], %s3901_s28  ;;  %s3516_s3 = scalar_lea.hbm %s4046_s1, 128 }
  0xf7   : > { %s750_s16 = sshll.u32 %s743_s4, 4  ;;  %p3517_p4 = scmp.ne.s32.totalorder %s4046_s1, %s3516_s3  ;;  %s751_s16 = int_to_ptr.vmem [resolvable:$true] %s750_s16 }
  0xf8   : > { %s3521_s5 = scalar_lea.hbm %s4440_s11, 384  ;;  %p3522_p13 = scmp.lt.s32.totalorder %s4046_s1, %s4440_s11 }
  0xf9   : > { %p3519_p7 = pnand %p3517_p4, %p3926_p11  ;;  %p3523_p0 = scmp.lt.s32.totalorder %s3521_s5, %s3516_s3 }
  0xfb   : > { %p3520_p5 = pneg %p3519_p7  ;;  %p3524_p2 = por %p3523_p0, %p3522_p13 }
  0xfd   : > { %p3525_p8 = pnand %p3524_p2, %p3520_p5 }
  0xff   : > { %3528 = shalt.err (!%p3525_p8)
}
 0x100   : > { %s3529_s14 = scalar_lea.vmem %s751_s16, 128  ;;  %s3677_s28 = smov [#allocation12]  }
 0x101   : > { %p3530_p12 = scmp.ne.s32.totalorder %s751_s16, %s3529_s14  ;;  %s3534_s8 = sshll.u32 %s3677_s28, 4  ;;  %s3535_s8 = int_to_ptr.vmem [resolvable:$false] %s3534_s8 }
 0x102   : > { %s3536_s2 = scalar_lea.vmem %s3535_s8, 256  ;;  %p3537_p1 = scmp.lt.s32.totalorder %s751_s16, %s3535_s8 }
 0x103   : > { %p3532_p6 = pnand %p3530_p12, %p3926_p11  ;;  %p3538_p3 = scmp.lt.s32.totalorder %s3536_s2, %s3529_s14 }
 0x105   : > { %p3533_p10 = pneg %p3532_p6  ;;  %p3539_p4 = por %p3538_p3, %p3537_p1 }
 0x107   : > { %p3540_p7 = pnand %p3539_p4, %p3533_p10 }
 0x109   : > { %3543 = shalt.err (!%p3540_p7)
}
 0x10a   : > { %3128 = dma.hbm_to_vmem [thread:$0]  (!%p3906_p9), %s4046_s1, 128, %s751_s16, %s3954_s6  }
 0x10b   : > { %p4441_p5 = scmp.ne.s32.totalorder %s4415_s0, 0 }
 0x10c   : > { %s761_s19 = sand.u32 (!%p4441_p5), 1, %s3650_s25   ;;  %p4442_p11 = scmp.ne.s32.totalorder (!%p4441_p5), %s4423_s21, 0 }
 0x10d   : > { %759 = sbr.rel (%p4441_p5) target bundleno = 2165 (0x875), region = 100  ;;  %s4086_s27 = sshll.u32 (!%p4441_p5), %s761_s19, 3 }
 0x10e   : > { %s762_s12 = scalar_lea.sflag (!%p4441_p5), [#allocation5], %s761_s19  ;;  %s765_s22 = scalar_lea.vmem (!%p4441_p5), [#allocation4], %s4086_s27 }
 0x112   : > { %3609 = dma.done.wait (%p4442_p11), %s762_s12, 128  }
 0x113   : > { %3611 = vsyncadd (%p4442_p11), %s762_s12, 4294967168  ;;  %s770_s20 = sand.u32 1, %s3816_s29   ;;  %s774_s0 = scalar_lea.vmem [#allocation7], %s4086_s27 }
 0x114   : > { %s771_s6 = scalar_lea.sflag [#allocation8], %s770_s20 }
 0x115   : > { %3613 = dma.done.wait (%p4442_p11), %s771_s6, 256  }
 0x116   : > { %3615 = vsyncadd (%p4442_p11), %s771_s6, 4294967040  ;;  %s783_s1 = scalar_lea.vmem [#allocation9], %s4086_s27  ;;  %s789_s10 = scalar_lea.sflag [#allocation11], %s770_s20 }
 0x117   : > { %s792_s13 = scalar_lea.vmem [#allocation10], %s4086_s27 }
 0x118   : > { %3617 = dma.done.wait (%p4442_p11), %s789_s10, 256  }
 0x119   : > { %3619 = vsyncadd (%p4442_p11), %s789_s10, 4294967040  ;;  %s801_s4 = scalar_lea.vmem [#allocation12], %s4086_s27  ;;  %p4443_p9 = scmp.eq.s32.totalorder %s3816_s29, 0 }
 0x11b   : > { %3621 = dma.done.wait (%p4443_p9), [#allocation14], 2048   ;;  %p4444_p13 = pmov %p4443_p9 }
 0x11c   : > { %p4445_p0 = pmov %p4443_p9 }
 0x11d   : > { %3623 = vsyncadd (%p4444_p13), [#allocation14], 4294965248 }
 0x11e   : > { %3625 = dma.done.wait (%p4445_p0), [#allocation17], 20480   ;;  %p4446_p2 = pmov %p4445_p0 }
 0x11f   : > { %p4447_p8 = pmov %p4445_p0 }
 0x120   : > { %3627 = vsyncadd (%p4446_p2), [#allocation17], 4294946816 }
 0x121   : > { %3629 = dma.done.wait (%p4447_p8), [#allocation20], 6144   ;;  %p4448_p12 = pmov %p4445_p0 }
 0x122   : > { %p4449_p6 = pmov %p4445_p0 }
 0x123   : > { %3631 = vsyncadd (%p4448_p12), [#allocation20], 4294961152 }
 0x124   : > { %3633 = dma.done.wait (%p4449_p6), [#allocation23], 2048   ;;  %p4450_p10 = pmov %p4445_p0 }
 0x125   : > { %p4451_p1 = scmp.ne.s32.totalorder %s3816_s29, 0 }
 0x126   : > { %3635 = vsyncadd (%p4450_p10), [#allocation23], 4294965248 }
 0x127   : > { %906 = sbr.rel (%p4451_p1) target bundleno = 317 (0x13d), region = 152 }
 0x12c   : > { %v3678_v0 = vmov 0.0  }
 0x12d   : > { %907 = vst [vmem:[#allocation2] sm:$0xff] %v3678_v0  ;;  %908 = vst [vmem:[#allocation2 + $0x8] sm:$0xff] %v3678_v0 }
 0x12e   : > { %909 = vst [vmem:[#allocation2 + $0x10] sm:$0xff] %v3678_v0  ;;  %910 = vst [vmem:[#allocation2 + $0x18] sm:$0xff] %v3678_v0 }
 0x12f   : > { %911 = vst [vmem:[#allocation2 + $0x20] sm:$0xff] %v3678_v0  ;;  %912 = vst [vmem:[#allocation2 + $0x28] sm:$0xff] %v3678_v0 }
 0x130   : > { %913 = vst [vmem:[#allocation2 + $0x30] sm:$0xff] %v3678_v0  ;;  %914 = vst [vmem:[#allocation2 + $0x38] sm:$0xff] %v3678_v0 }
 0x131   : > { %915 = vst [vmem:[#allocation2 + $0x40] sm:$0xff] %v3678_v0  ;;  %916 = vst [vmem:[#allocation2 + $0x48] sm:$0xff] %v3678_v0 }
 0x132   : > { %917 = vst [vmem:[#allocation2 + $0x50] sm:$0xff] %v3678_v0  ;;  %918 = vst [vmem:[#allocation2 + $0x58] sm:$0xff] %v3678_v0 }
 0x133   : > { %919 = vst [vmem:[#allocation2 + $0x60] sm:$0xff] %v3678_v0  ;;  %920 = vst [vmem:[#allocation2 + $0x68] sm:$0xff] %v3678_v0 }
 0x134   : > { %921 = vst [vmem:[#allocation2 + $0x70] sm:$0xff] %v3678_v0  ;;  %922 = vst [vmem:[#allocation2 + $0x78] sm:$0xff] %v3678_v0 }
 0x135   : > { %923 = vst [vmem:[#allocation3] sm:$0xff] %v3678_v0  ;;  %924 = vst [vmem:[#allocation3 + $0x8] sm:$0xff] %v3678_v0 }
 0x136   : > { %925 = vst [vmem:[#allocation3 + $0x10] sm:$0xff] %v3678_v0  ;;  %926 = vst [vmem:[#allocation3 + $0x18] sm:$0xff] %v3678_v0 }
 0x137   : > { %927 = vst [vmem:[#allocation3 + $0x20] sm:$0xff] %v3678_v0  ;;  %928 = vst [vmem:[#allocation3 + $0x28] sm:$0xff] %v3678_v0 }
 0x138   : > { %929 = vst [vmem:[#allocation3 + $0x30] sm:$0xff] %v3678_v0  ;;  %930 = vst [vmem:[#allocation3 + $0x38] sm:$0xff] %v3678_v0 }
 0x139   : > { %931 = vst [vmem:[#allocation3 + $0x40] sm:$0xff] %v3678_v0  ;;  %932 = vst [vmem:[#allocation3 + $0x48] sm:$0xff] %v3678_v0 }
 0x13a   : > { %933 = vst [vmem:[#allocation3 + $0x50] sm:$0xff] %v3678_v0  ;;  %934 = vst [vmem:[#allocation3 + $0x58] sm:$0xff] %v3678_v0 }
 0x13b   : > { %935 = vst [vmem:[#allocation3 + $0x60] sm:$0xff] %v3678_v0  ;;  %936 = vst [vmem:[#allocation3 + $0x68] sm:$0xff] %v3678_v0 }
 0x13c   : > { %937 = vst [vmem:[#allocation3 + $0x70] sm:$0xff] %v3678_v0  ;;  %938 = vst [vmem:[#allocation3 + $0x78] sm:$0xff] %v3678_v0 }
 0x13d PF: > { %v947_v1 = vld [vmem:[#allocation13 + $0x38] sm:$0xff]  ;;  %v3679_v3 = vmov 0.0   ;;  %v946_v4 = vld [vmem:[#allocation13 + $0x30] sm:$0xff]  ;;  %v945_v6 = vld [vmem:[#allocation13 + $0x28] sm:$0xff]  ;;  %vm955_vm0 = vcmask 523264   ;;  %vm3680_vm1 = vmmov 0  }
 0x13e   : > { %v1043_v2 = vld [vmem:[#allocation15 + $0x38] sm:$0xff]  ;;  %2817 = vmatprep.subr.mxu0 %v3679_v3  ;;  %2836 = vmatprep.subr.mxu1 %v3679_v3  ;;  %v1042_v5 = vld [vmem:[#allocation15 + $0x30] sm:$0xff]  ;;  %v1041_v7 = vld [vmem:[#allocation15 + $0x28] sm:$0xff]  ;;  %s4452_s30 = sld [smem:[#allocation46_spill]]  ;;  %vm1455_vm4 = vcmask 64512   ;;  %s2628_s12 = sshll.u32 %s3816_s29, 3 }
 0x13f   : > { %2818 = vmatpush3.msra.mxu0 %v947_v1  ;;  %2837 = vmatpush3.msra.mxu1 %v1043_v2  ;;  %v944_v8 = vld [vmem:[#allocation13 + $0x20] sm:$0xff]  ;;  %v943_v10 = vld [vmem:[#allocation13 + $0x18] sm:$0xff]  ;;  %v942_v12 = vld [vmem:[#allocation13 + $0x10] sm:$0xff]  ;;  %s4453_s23 = sld [smem:[#allocation48_spill]]  ;;  %s2061_s20 = scalar_lea.vmem [#allocation2], %s2628_s12 }
 0x140   : > { %2819 = vmatprep.subr.mxu0 %v3679_v3  ;;  %2838 = vmatprep.subr.mxu1 %v3679_v3  ;;  %v1040_v9 = vld [vmem:[#allocation15 + $0x20] sm:$0xff]  ;;  %v1039_v11 = vld [vmem:[#allocation15 + $0x18] sm:$0xff]  ;;  %v1038_v13 = vld [vmem:[#allocation15 + $0x10] sm:$0xff]  ;;  %s4454_s8 = sld [smem:[#allocation52_spill]]  ;;  %p2629_p3 = scmp.ne.s32.totalorder %s3816_s29, 2 }
 0x141   : > { %2820 = vmatpush3.msra.mxu0 %v946_v4  ;;  %2839 = vmatpush3.msra.mxu1 %v1042_v5  ;;  %v941_v14 = vld [vmem:[#allocation13 + $0x8] sm:$0xff]  ;;  %v940_v16 = vld [vmem:[#allocation13] sm:$0xff]  ;;  %v939_v18 = vld [vmem:[%s765_s22] sm:$0xff]  ;;  %s4455_s27 = sld [smem:[#allocation50_spill]]  ;;  %s2063_s22 = scalar_lea.vmem [#allocation3], %s2628_s12 }
 0x142   : > { %2821 = vmatprep.subr.mxu0 %v3679_v3  ;;  %2840 = vmatprep.subr.mxu1 %v3679_v3  ;;  %v1037_v15 = vld [vmem:[#allocation15 + $0x8] sm:$0xff]  ;;  %v1036_v17 = vld [vmem:[#allocation15] sm:$0xff]  ;;  %v1161_v20 = vld [vmem:[#allocation16 + $0xf8] sm:$0xff]  ;;  %s4458_s3 = sld [smem:[#allocation55_spill]] (!%p2629_p3) }
 0x143   : > { %2822 = vmatpush3.msra.mxu0 %v945_v6  ;;  %2841 = vmatpush3.msra.mxu1 %v1041_v7  ;;  %v1035_v19 = vld [vmem:[%s774_s0] sm:$0xff]  ;;  %v1160_v21 = vld [vmem:[#allocation16 + $0xf0] sm:$0xff]  ;;  %v1157_v24 = vld [vmem:[#allocation16 + $0xd8] sm:$0xff] }
 0x144   : > { %2823 = vmatprep.subr.mxu0 %v3679_v3  ;;  %2842 = vmatprep.subr.mxu1 %v3679_v3  ;;  %v1159_v22 = vld [vmem:[#allocation16 + $0xe8] sm:$0xff]  ;;  %v1158_v23 = vld [vmem:[#allocation16 + $0xe0] sm:$0xff]  ;;  %v1156_v25 = vld [vmem:[#allocation16 + $0xd0] sm:$0xff] }
 0x145   : > { %2824 = vmatpush3.msra.mxu0 %v944_v8  ;;  %2843 = vmatpush3.msra.mxu1 %v1040_v9  ;;  %v1155_v26 = vld [vmem:[#allocation16 + $0xc8] sm:$0xff]  ;;  %v1154_v27 = vld [vmem:[#allocation16 + $0xc0] sm:$0xff]  ;;  %v1153_v28 = vld [vmem:[#allocation16 + $0xb8] sm:$0xff] }
 0x146   : > { %2825 = vmatprep.subr.mxu0 %v3679_v3  ;;  %2844 = vmatprep.subr.mxu1 %v3679_v3  ;;  %v1152_v29 = vld [vmem:[#allocation16 + $0xb0] sm:$0xff]  ;;  %v1151_v30 = vld [vmem:[#allocation16 + $0xa8] sm:$0xff]  ;;  %v1150_v31 = vld [vmem:[#allocation16 + $0xa0] sm:$0xff] }
 0x147   : > { %2826 = vmatpush3.msra.mxu0 %v943_v10  ;;  %2845 = vmatpush3.msra.mxu1 %v1039_v11  ;;  %v1149_v32 = vld [vmem:[#allocation16 + $0x98] sm:$0xff]  ;;  %v1148_v33 = vld [vmem:[#allocation16 + $0x90] sm:$0xff]  ;;  %v1147_v34 = vld [vmem:[#allocation16 + $0x88] sm:$0xff] }
 0x148   : > { %2827 = vmatprep.subr.mxu0 %v3679_v3  ;;  %2846 = vmatprep.subr.mxu1 %v3679_v3  ;;  %v1146_v35 = vld [vmem:[#allocation16 + $0x80] sm:$0xff]  ;;  %v1145_v36 = vld [vmem:[#allocation16 + $0x78] sm:$0xff]  ;;  %v1144_v37 = vld [vmem:[#allocation16 + $0x70] sm:$0xff] }
 0x149   : > { %2828 = vmatpush3.msra.mxu0 %v942_v12  ;;  %2847 = vmatpush3.msra.mxu1 %v1038_v13  ;;  %v1143_v38 = vld [vmem:[#allocation16 + $0x68] sm:$0xff]  ;;  %v1142_v39 = vld [vmem:[#allocation16 + $0x60] sm:$0xff]  ;;  %v1141_v40 = vld [vmem:[#allocation16 + $0x58] sm:$0xff] }
 0x14a   : > { %2829 = vmatprep.subr.mxu0 %v3679_v3  ;;  %2848 = vmatprep.subr.mxu1 %v3679_v3  ;;  %v1140_v41 = vld [vmem:[#allocation16 + $0x50] sm:$0xff]  ;;  %v1139_v42 = vld [vmem:[#allocation16 + $0x48] sm:$0xff]  ;;  %v1138_v43 = vld [vmem:[#allocation16 + $0x40] sm:$0xff] }
 0x14b   : > { %2830 = vmatpush3.msra.mxu0 %v941_v14  ;;  %2849 = vmatpush3.msra.mxu1 %v1037_v15  ;;  %v1137_v44 = vld [vmem:[#allocation16 + $0x38] sm:$0xff]  ;;  %v1136_v45 = vld [vmem:[#allocation16 + $0x30] sm:$0xff]  ;;  %v1135_v46 = vld [vmem:[#allocation16 + $0x28] sm:$0xff] }
 0x14c   : > { %2831 = vmatprep.subr.mxu0 %v3679_v3  ;;  %2850 = vmatprep.subr.mxu1 %v3679_v3  ;;  %v1134_v47 = vld [vmem:[#allocation16 + $0x20] sm:$0xff]  ;;  %v1133_v48 = vld [vmem:[#allocation16 + $0x18] sm:$0xff]  ;;  %v1132_v49 = vld [vmem:[#allocation16 + $0x10] sm:$0xff] }
 0x14d   : > { %2832 = vmatpush3.msra.mxu0 %v940_v16  ;;  %2833 = vmatprep.mubr.msk.f32.mxu0 %vm3680_vm1, %v3679_v3  ;;  %v1131_v50 = vld [vmem:[#allocation16 + $0x8] sm:$0xff]  ;;  %v1130_v51 = vld [vmem:[#allocation16] sm:$0xff]  ;;  %v1193_v52 = vld [vmem:[#allocation16 + $0x1f8] sm:$0xff] }
 0x14e   : > { %2851 = vmatpush3.msra.mxu1 %v1036_v17  ;;  %2852 = vmatprep.mubr.msk.f32.mxu1 %vm3680_vm1, %v3679_v3  ;;  %v1192_v53 = vld [vmem:[#allocation16 + $0x1f0] sm:$0xff]  ;;  %v1191_v54 = vld [vmem:[#allocation16 + $0x1e8] sm:$0xff]  ;;  %v1190_v55 = vld [vmem:[#allocation16 + $0x1e0] sm:$0xff] }
 0x14f   : > { %2834 = vmatmul.mubr.msk.f32.vlgmr.msra.gmra.mxu0 %vm955_vm0, %v939_v18  ;;  %2853 = vmatmul.mubr.msk.f32.vlgmr.msra.gmra.mxu1 %vm955_vm0, %v1035_v19  ;;  %v1189_v56 = vld [vmem:[#allocation16 + $0x1d8] sm:$0xff]  ;;  %v1188_v57 = vld [vmem:[#allocation16 + $0x1d0] sm:$0xff]  ;;  %v1187_v58 = vld [vmem:[#allocation16 + $0x1c8] sm:$0xff] }
 0x150   : > { %1206 = vmatprep.subr.mxu0 %v1161_v20  ;;  %2855 = vmatprep.subr.mxu1 %v3679_v3  ;;  %v1186_v59 = vld [vmem:[#allocation16 + $0x1c0] sm:$0xff]  ;;  %v1185_v60 = vld [vmem:[#allocation16 + $0x1b8] sm:$0xff]  ;;  %v1184_v61 = vld [vmem:[#allocation16 + $0x1b0] sm:$0xff] }
 0x151   : > { %1207 = vmatpush1.msra.mxu0 %v1160_v21  ;;  %2887 = vmatprep.mubr.msk.f32.mxu1 %vm3680_vm1, %v3679_v3  ;;  %v1183_v62 = vld [vmem:[#allocation16 + $0x1a8] sm:$0xff]  ;;  %v1182_v63 = vld [vmem:[#allocation16 + $0x1a0] sm:$0xff]  ;;  %v1181_v0 = vld [vmem:[#allocation16 + $0x198] sm:$0xff] }
 0x152   : > { %1208 = vmatprep.subr.mxu0 %v1159_v22  ;;  %v1180_v1 = vld [vmem:[#allocation16 + $0x190] sm:$0xff]  ;;  %v1179_v2 = vld [vmem:[#allocation16 + $0x188] sm:$0xff]  ;;  %v1178_v4 = vld [vmem:[#allocation16 + $0x180] sm:$0xff] }
 0x153   : > { %1209 = vmatpush1.msra.mxu0 %v1158_v23  ;;  %v1177_v5 = vld [vmem:[#allocation16 + $0x178] sm:$0xff]  ;;  %v1176_v6 = vld [vmem:[#allocation16 + $0x170] sm:$0xff]  ;;  %v1175_v7 = vld [vmem:[#allocation16 + $0x168] sm:$0xff] }
 0x154   : > { %1210 = vmatprep.subr.mxu0 %v1157_v24  ;;  %v1174_v8 = vld [vmem:[#allocation16 + $0x160] sm:$0xff]  ;;  %v1173_v9 = vld [vmem:[#allocation16 + $0x158] sm:$0xff]  ;;  %v1172_v10 = vld [vmem:[#allocation16 + $0x150] sm:$0xff] }
 0x155   : > { %1211 = vmatpush1.msra.mxu0 %v1156_v25  ;;  %v1171_v11 = vld [vmem:[#allocation16 + $0x148] sm:$0xff]  ;;  %v1170_v12 = vld [vmem:[#allocation16 + $0x140] sm:$0xff]  ;;  %v1169_v13 = vld [vmem:[#allocation16 + $0x138] sm:$0xff] }
 0x156   : > { %1212 = vmatprep.subr.mxu0 %v1155_v26  ;;  %v1168_v14 = vld [vmem:[#allocation16 + $0x130] sm:$0xff]  ;;  %v1167_v15 = vld [vmem:[#allocation16 + $0x128] sm:$0xff]  ;;  %v1166_v16 = vld [vmem:[#allocation16 + $0x120] sm:$0xff] }
 0x157   : > { %1213 = vmatpush1.msra.mxu0 %v1154_v27  ;;  %v1165_v17 = vld [vmem:[#allocation16 + $0x118] sm:$0xff]  ;;  %v1164_v18 = vld [vmem:[#allocation16 + $0x110] sm:$0xff]  ;;  %v1163_v19 = vld [vmem:[#allocation16 + $0x108] sm:$0xff] }
 0x158   : > { %1214 = vmatprep.subr.mxu0 %v1153_v28  ;;  %v1162_v20 = vld [vmem:[#allocation16 + $0x100] sm:$0xff]  ;;  %v1297_v21 = vld [vmem:[#allocation2 + $0x78] sm:$0xff]  ;;  %v1295_v23 = vld [vmem:[#allocation2 + $0x68] sm:$0xff] }
 0x159   : > { %1215 = vmatpush1.msra.mxu0 %v1152_v29  ;;  %v1296_v22 = vld [vmem:[#allocation2 + $0x70] sm:$0xff]  ;;  %2856 = vmatpush3.msra.mxu1 %v1297_v21  ;;  %v1294_v24 = vld [vmem:[#allocation2 + $0x60] sm:$0xff]  ;;  %v1293_v25 = vld [vmem:[#allocation2 + $0x58] sm:$0xff] }
 0x15a   : > { %1216 = vmatprep.subr.mxu0 %v1151_v30  ;;  %2857 = vmatprep.subr.mxu1 %v3679_v3  ;;  %v1292_v26 = vld [vmem:[#allocation2 + $0x50] sm:$0xff]  ;;  %v1291_v27 = vld [vmem:[#allocation2 + $0x48] sm:$0xff]  ;;  %v1290_v28 = vld [vmem:[#allocation2 + $0x40] sm:$0xff] }
 0x15b   : > { %1217 = vmatpush1.msra.mxu0 %v1150_v31  ;;  %2858 = vmatpush3.msra.mxu1 %v1296_v22  ;;  %v1289_v29 = vld [vmem:[#allocation2 + $0x38] sm:$0xff]  ;;  %v1288_v30 = vld [vmem:[#allocation2 + $0x30] sm:$0xff]  ;;  %v1287_v31 = vld [vmem:[#allocation2 + $0x28] sm:$0xff] }
 0x15c   : > { %1218 = vmatprep.subr.mxu0 %v1149_v32  ;;  %2859 = vmatprep.subr.mxu1 %v3679_v3  ;;  %v1286_v32 = vld [vmem:[#allocation2 + $0x20] sm:$0xff]  ;;  %v1614_v21 = vld [vmem:[#allocation19 + $0x58] sm:$0xff] }
 0x15d   : > { %1219 = vmatpush1.msra.mxu0 %v1148_v33  ;;  %2860 = vmatpush3.msra.mxu1 %v1295_v23  ;;  %v1285_v33 = vld [vmem:[#allocation2 + $0x18] sm:$0xff]  ;;  %v1629_v22 = vld [vmem:[#allocation19 + $0xd0] sm:$0xff] }
 0x15e   : > { %1220 = vmatprep.subr.mxu0 %v1147_v34  ;;  %2861 = vmatprep.subr.mxu1 %v3679_v3  ;;  %v1284_v34 = vld [vmem:[#allocation2 + $0x10] sm:$0xff]  ;;  %v1613_v23 = vld [vmem:[#allocation19 + $0x50] sm:$0xff] }
 0x15f   : > { %1221 = vmatpush1.msra.mxu0 %v1146_v35  ;;  %2862 = vmatpush3.msra.mxu1 %v1294_v24  ;;  %v1283_v35 = vld [vmem:[#allocation2 + $0x8] sm:$0xff]  ;;  %v1628_v24 = vld [vmem:[#allocation19 + $0xc8] sm:$0xff] }
 0x160   : > { %1222 = vmatprep.subr.mxu0 %v1145_v36  ;;  %2863 = vmatprep.subr.mxu1 %v3679_v3  ;;  %v1282_v36 = vld [vmem:[#allocation2] sm:$0xff] }
 0x161   : > { %1223 = vmatpush1.msra.mxu0 %v1144_v37  ;;  %2864 = vmatpush3.msra.mxu1 %v1293_v25  ;;  %v4168_v37 = vld [vmem:[%s783_s1] sm:$0xff]  ;;  %v1612_v25 = vld [vmem:[#allocation19 + $0x48] sm:$0xff]  ;;  %s4456_s1 = sld [smem:[#allocation43_spill]] (!%p2629_p3) }
 0x162   : > { %1224 = vmatprep.subr.mxu0 %v1143_v38  ;;  %2865 = vmatprep.subr.mxu1 %v3679_v3  ;;  %v1383_v38 = vld [vmem:[#allocation3 + $0x78] sm:$0xff] }
 0x163   : > { %1225 = vmatpush1.msra.mxu0 %v1142_v39  ;;  %2866 = vmatpush3.msra.mxu1 %v1292_v26  ;;  %v1382_v39 = vld [vmem:[#allocation3 + $0x70] sm:$0xff] }
 0x164   : > { %1226 = vmatprep.subr.mxu0 %v1141_v40  ;;  %2867 = vmatprep.subr.mxu1 %v3679_v3  ;;  %v1381_v40 = vld [vmem:[#allocation3 + $0x68] sm:$0xff]  ;;  %v1627_v26 = vld [vmem:[#allocation19 + $0xc0] sm:$0xff] }
 0x165   : > { %1227 = vmatpush1.msra.mxu0 %v1140_v41  ;;  %2868 = vmatpush3.msra.mxu1 %v1291_v27  ;;  %v1380_v41 = vld [vmem:[#allocation3 + $0x60] sm:$0xff]  ;;  %v1611_v27 = vld [vmem:[#allocation19 + $0x40] sm:$0xff] }
 0x166   : > { %1228 = vmatprep.subr.mxu0 %v1139_v42  ;;  %2869 = vmatprep.subr.mxu1 %v3679_v3  ;;  %v1379_v42 = vld [vmem:[#allocation3 + $0x58] sm:$0xff] }
 0x167   : > { %1229 = vmatpush1.msra.mxu0 %v1138_v43  ;;  %2870 = vmatpush3.msra.mxu1 %v1290_v28  ;;  %v1378_v43 = vld [vmem:[#allocation3 + $0x50] sm:$0xff]  ;;  %v1626_v28 = vld [vmem:[#allocation19 + $0xb8] sm:$0xff] }
 0x168   : > { %1230 = vmatprep.subr.mxu0 %v1137_v44  ;;  %2871 = vmatprep.subr.mxu1 %v3679_v3  ;;  %v2615_v44 = vld [vmem:[%s4358_s7] ss:$0 sm:$0xff] }
 0x169   : > { %1231 = vmatpush1.msra.mxu0 %v1136_v45  ;;  %2872 = vmatpush3.msra.mxu1 %v1289_v29  ;;  %v2618_v45 = vld [vmem:[%s4452_s30] ss:$0 sm:$0xff]  ;;  %v1610_v29 = vld [vmem:[#allocation19 + $0x38] sm:$0xff] }
 0x16a   : > { %1232 = vmatprep.subr.mxu0 %v1135_v46  ;;  %2873 = vmatprep.subr.mxu1 %v3679_v3 }
 0x16b   : > { %1233 = vmatpush1.msra.mxu0 %v1134_v47  ;;  %2874 = vmatpush3.msra.mxu1 %v1288_v30  ;;  %v1625_v30 = vld [vmem:[#allocation19 + $0xb0] sm:$0xff] }
 0x16c   : > { %1234 = vmatprep.subr.mxu0 %v1133_v48  ;;  %2875 = vmatprep.subr.mxu1 %v3679_v3 }
 0x16d   : > { %1235 = vmatpush1.msra.mxu0 %v1132_v49  ;;  %2876 = vmatpush3.msra.mxu1 %v1287_v31  ;;  %v1609_v31 = vld [vmem:[#allocation19 + $0x30] sm:$0xff] }
 0x16e   : > { %1236 = vmatprep.subr.mxu0 %v1131_v50  ;;  %2877 = vmatprep.subr.mxu1 %v3679_v3 }
 0x16f   : > { %1237 = vmatpush1.msra.mxu0 %v1130_v51  ;;  %2878 = vmatpush3.msra.mxu1 %v1286_v32  ;;  %v1624_v32 = vld [vmem:[#allocation19 + $0xa8] sm:$0xff] }
 0x170   : > { %1238 = vmatprep.subr.mxu0 %v1193_v52  ;;  %2879 = vmatprep.subr.mxu1 %v3679_v3 }
 0x171   : > { %1239 = vmatpush2.msra.mxu0 %v1192_v53  ;;  %2880 = vmatpush3.msra.mxu1 %v1285_v33  ;;  %v1608_v33 = vld [vmem:[#allocation19 + $0x28] sm:$0xff] }
 0x172   : > { %1240 = vmatprep.subr.mxu0 %v1191_v54  ;;  %2881 = vmatprep.subr.mxu1 %v3679_v3 }
 0x173   : > { %1241 = vmatpush2.msra.mxu0 %v1190_v55  ;;  %2882 = vmatpush3.msra.mxu1 %v1284_v34  ;;  %v1623_v34 = vld [vmem:[#allocation19 + $0xa0] sm:$0xff] }
 0x174   : > { %1242 = vmatprep.subr.mxu0 %v1189_v56  ;;  %2883 = vmatprep.subr.mxu1 %v3679_v3 }
 0x175   : > { %1243 = vmatpush2.msra.mxu0 %v1188_v57  ;;  %2884 = vmatpush3.msra.mxu1 %v1283_v35  ;;  %v1607_v35 = vld [vmem:[#allocation19 + $0x20] sm:$0xff] }
 0x176   : > { %1244 = vmatprep.subr.mxu0 %v1187_v58  ;;  %2885 = vmatprep.subr.mxu1 %v3679_v3 }
 0x177   : > { %1245 = vmatpush2.msra.mxu0 %v1186_v59  ;;  %2886 = vmatpush3.msra.mxu1 %v1282_v36  ;;  %v1622_v36 = vld [vmem:[#allocation19 + $0x98] sm:$0xff] }
 0x178   : > { %1246 = vmatprep.subr.mxu0 %v1185_v60  ;;  %2888 = vmatmul.mubr.f32.vlgmr.msra.gmra.mxu1 %v4168_v37 }
 0x179   : > { %1247 = vmatpush2.msra.mxu0 %v1184_v61  ;;  %2890 = vmatprep.subr.mxu1 %v3679_v3 }
 0x17a   : > { %1248 = vmatprep.subr.mxu0 %v1183_v62  ;;  %2891 = vmatpush3.msra.mxu1 %v1383_v38  ;;  %v1377_v62 = vld [vmem:[#allocation3 + $0x48] sm:$0xff]  ;;  %v1621_v38 = vld [vmem:[#allocation19 + $0x90] sm:$0xff] }
 0x17b   : > { %1249 = vmatpush2.msra.mxu0 %v1182_v63  ;;  %2922 = vmatprep.mubr.msk.f32.mxu1 %vm3680_vm1, %v3679_v3  ;;  %v1376_v63 = vld [vmem:[#allocation3 + $0x40] sm:$0xff] }
 0x17c   : > { %1250 = vmatprep.subr.mxu0 %v1181_v0  ;;  %2892 = vmatprep.subr.mxu1 %v3679_v3  ;;  %v1375_v0 = vld [vmem:[#allocation3 + $0x38] sm:$0xff] }
 0x17d   : > { %1251 = vmatpush2.msra.mxu0 %v1180_v1  ;;  %2893 = vmatpush3.msra.mxu1 %v1382_v39  ;;  %v1374_v1 = vld [vmem:[#allocation3 + $0x30] sm:$0xff]  ;;  %v1605_v39 = vld [vmem:[#allocation19 + $0x10] sm:$0xff] }
 0x17e   : > { %1252 = vmatprep.subr.mxu0 %v1179_v2  ;;  %2894 = vmatprep.subr.mxu1 %v3679_v3  ;;  %v1373_v2 = vld [vmem:[#allocation3 + $0x28] sm:$0xff] }
 0x17f   : > { %1253 = vmatpush2.msra.mxu0 %v1178_v4  ;;  %2895 = vmatpush3.msra.mxu1 %v1381_v40  ;;  %v1372_v4 = vld [vmem:[#allocation3 + $0x20] sm:$0xff]  ;;  %v1620_v40 = vld [vmem:[#allocation19 + $0x88] sm:$0xff] }
 0x180   : > { %1254 = vmatprep.subr.mxu0 %v1177_v5  ;;  %2896 = vmatprep.subr.mxu1 %v3679_v3  ;;  %v1371_v5 = vld [vmem:[#allocation3 + $0x18] sm:$0xff] }
 0x181   : > { %1255 = vmatpush2.msra.mxu0 %v1176_v6  ;;  %2897 = vmatpush3.msra.mxu1 %v1380_v41  ;;  %v1370_v6 = vld [vmem:[#allocation3 + $0x10] sm:$0xff]  ;;  %v1604_v41 = vld [vmem:[#allocation19 + $0x8] sm:$0xff] }
 0x182   : > { %1256 = vmatprep.subr.mxu0 %v1175_v7  ;;  %2898 = vmatprep.subr.mxu1 %v3679_v3  ;;  %v1369_v7 = vld [vmem:[#allocation3 + $0x8] sm:$0xff] }
 0x183   : > { %1257 = vmatpush2.msra.mxu0 %v1174_v8  ;;  %2899 = vmatpush3.msra.mxu1 %v1379_v42  ;;  %v1368_v8 = vld [vmem:[#allocation3] sm:$0xff]  ;;  %v1619_v42 = vld [vmem:[#allocation19 + $0x80] sm:$0xff] }
 0x184   : > { %1258 = vmatprep.subr.mxu0 %v1173_v9  ;;  %2900 = vmatprep.subr.mxu1 %v3679_v3  ;;  %v4204_v9 = vld [vmem:[%s792_s13] sm:$0xff] }
 0x185   : > { %1259 = vmatpush2.msra.mxu0 %v1172_v10  ;;  %2901 = vmatpush3.msra.mxu1 %v1378_v43  ;;  %v1634_v10 = vld [vmem:[#allocation19 + $0xf8] sm:$0xff]  ;;  %v1603_v43 = vld [vmem:[#allocation19] sm:$0xff] }
 0x186   : > { %1260 = vmatprep.subr.mxu0 %v1171_v11  ;;  %2902 = vmatprep.subr.mxu1 %v3679_v3 }
 0x187   : > { %1261 = vmatpush2.msra.mxu0 %v1170_v12  ;;  %2903 = vmatpush3.msra.mxu1 %v1377_v62  ;;  %v1618_v12 = vld [vmem:[#allocation19 + $0x78] sm:$0xff] }
 0x188   : > { %1262 = vmatprep.subr.mxu0 %v1169_v13  ;;  %2904 = vmatprep.subr.mxu1 %v3679_v3  ;;  %v1633_v13 = vld [vmem:[#allocation19 + $0xf0] sm:$0xff]  ;;  %v1884_v62 = vld [vmem:[#allocation18 + $0x2f8] sm:$0xff] }
 0x189   : > { %1263 = vmatpush2.msra.mxu0 %v1168_v14  ;;  %2905 = vmatpush3.msra.mxu1 %v1376_v63 }
 0x18a   : > { %1264 = vmatprep.subr.mxu0 %v1167_v15  ;;  %2906 = vmatprep.subr.mxu1 %v3679_v3  ;;  %v1617_v15 = vld [vmem:[#allocation19 + $0x70] sm:$0xff] }
 0x18b   : > { %1265 = vmatpush2.msra.mxu0 %v1166_v16  ;;  %2907 = vmatpush3.msra.mxu1 %v1375_v0  ;;  %v1632_v16 = vld [vmem:[#allocation19 + $0xe8] sm:$0xff] }
 0x18c   : > { %1266 = vmatprep.subr.mxu0 %v1165_v17  ;;  %2908 = vmatprep.subr.mxu1 %v3679_v3  ;;  %v1616_v17 = vld [vmem:[#allocation19 + $0x68] sm:$0xff] }
 0x18d   : > { %1267 = vmatpush2.msra.mxu0 %v1164_v18  ;;  %2909 = vmatpush3.msra.mxu1 %v1374_v1  ;;  %v1631_v18 = vld [vmem:[#allocation19 + $0xe0] sm:$0xff]  ;;  %v1836_v1 = vld [vmem:[#allocation18 + $0x178] sm:$0xff] }
 0x18e   : > { %1268 = vmatprep.subr.mxu0 %v1163_v19  ;;  %2910 = vmatprep.subr.mxu1 %v3679_v3  ;;  %v1615_v19 = vld [vmem:[#allocation19 + $0x60] sm:$0xff] }
 0x18f   : > { %1269 = vmatpush2.msra.mxu0 %v1162_v20  ;;  %2911 = vmatpush3.msra.mxu1 %v1373_v2  ;;  %v1630_v20 = vld [vmem:[#allocation19 + $0xd8] sm:$0xff] }
 0x190   : > { %2925 = vmatprep.subr.mxu0 %v3679_v3  ;;  %2912 = vmatprep.subr.mxu1 %v3679_v3 }
 0x191   : > { %2913 = vmatpush3.msra.mxu1 %v1372_v4  ;;  %v1881_v4 = vld [vmem:[#allocation18 + $0x2e0] sm:$0xff] }
 0x192   : > { %2914 = vmatprep.subr.mxu1 %v3679_v3 }
 0x193   : > { %2915 = vmatpush3.msra.mxu1 %v1371_v5  ;;  %v1833_v5 = vld [vmem:[#allocation18 + $0x160] sm:$0xff] }
 0x194   : > { %2916 = vmatprep.subr.mxu1 %v3679_v3 }
 0x195   : > { %2917 = vmatpush3.msra.mxu1 %v1370_v6 }
 0x196   : > { %2918 = vmatprep.subr.mxu1 %v3679_v3 }
 0x197   : > { %2919 = vmatpush3.msra.mxu1 %v1369_v7  ;;  %v1878_v7 = vld [vmem:[#allocation18 + $0x2c8] sm:$0xff] }
 0x198   : > { %2920 = vmatprep.subr.mxu1 %v3679_v3 }
 0x199   : > { %2921 = vmatpush3.msra.mxu1 %v1368_v8  ;;  %v1875_v8 = vld [vmem:[#allocation18 + $0x2b0] sm:$0xff] }
 0x19a   : > { %2923 = vmatmul.mubr.f32.vlgmr.msra.gmra.mxu1 %v4168_v37  ;;  %2930 = vmatprep.subr.mxu1 %v3679_v3  ;;  %v1606_v37 = vld [vmem:[#allocation19 + $0x18] sm:$0xff] }
 0x19b   : > { %2932 = vmatprep.mubr.msk.f32.mxu1 %vm3680_vm1, %v3679_v3 }
 0x20f   : > { %v1025_v46 = vpop.f32.mrf.mxu0  ;;  %v1120_v47 = vpop.f32.mrf.mxu1 }
 0x210   : > { %v1026_v48 = vadd.f32 %v2615_v44, %v1025_v46  ;;  %v1121_v49 = vadd.f32 %v2618_v45, %v1120_v47  ;;  %v1196_v44 = vlaneseq  ;;  %v1194_v47 = vld [vmem:[%s4453_s23] sm:$0x3] }
 0x211   : > { %v2835_v50 = vpop.f32.mrf.mxu0  ;;  %v2854_v51 = vpop.f32.mrf.mxu1 }
 0x212   : > { %v1030_v52 = vmin.f32 %v1026_v48, 0.0  ;;  %v1125_v53 = vmin.f32 %v1121_v49, 0.0  ;;  %vm1029_vm2 = vcmp.gt.f32.partialorder %v1026_v48, 0.0  ;;  %vm1124_vm3 = vcmp.gt.f32.partialorder %v1121_v49, 0.0 }
 0x213   : > { %v4208_v45 = vshrl.u32 %v1196_v44, 7 }
 0x214   : > { %v1031_v54 = vmul.f32 1.442695, %v1030_v52  ;;  %v1126_v55 = vmul.f32 1.442695, %v1125_v53 }
 0x215   : > { %v1198_v46 = vsub.s32 0, %v4208_v45 }
 0x216   : > { %3200 = vpow2.f32 %v1031_v54 }
 0x217   : > { %3202 = vpow2.f32 %v1126_v55 }
 0x223   : > { %v3201_v56 = vpop.eup %3200 }
 0x224   : > { %v3203_v57 = vpop.eup %3202  ;;  %v2617_v58 = vadd.f32 -1.0, %v3201_v56 }
 0x225   : > { %v2620_v59 = vadd.f32 -1.0, %v3203_v57 }
 0x226   : > { %v1034_v60 = vsel %vm1029_vm2, %v1026_v48, %v2617_v58  ;;  %v1202_v48 = vsub.s32 1, %v4208_v45  ;;  %v1529_v58 = vld [vmem:[%s801_s4] sm:$0xff]  ;;  %s4457_s4 = sld [smem:[#allocation54_spill]] (!%p2629_p3) }
 0x227   : > { %v1129_v61 = vsel %vm1124_vm3, %v1121_v49, %v2620_v59  ;;  %v1199_v49 = vrot.slane %v1194_v47, %v1198_v46 }
 0x228   : > { %1270 = vmatprep.mubr.f32.mxu0 %v1129_v61  ;;  %v1203_v50 = vrot.slane %v1194_v47, %v1202_v48  ;;  %v1835_v47 = vld [vmem:[#allocation18 + $0x170] sm:$0xff] }
 0x229   : > { %1271 = vmatmul.mubr.f32.vlgmr.msra.gmra.mxu0 %v1034_v60 }
 0x22a   : > { %2927 = vmatprep.mubr.msk.f32.mxu0 %vm3680_vm1, %v3679_v3 }
 0x238   : > { %v1364_v11 = vpop.f32.mrf.mxu1 }
 0x239   : > { %2926 = vmatpush3.msra.mxu0 %v1364_v11 }
 0x23a   : > { %2928 = vmatmul.mubr.msk.f32.vlgmr.msra.gmra.mxu0 %vm1455_vm4, %v4204_v9  ;;  %v2889_v14 = vpop.f32.mrf.mxu1  ;;  %2694 = vmatprep.subr.mxu0 %v1634_v10  ;;  %v1827_v10 = vld [vmem:[#allocation18 + $0x130] sm:$0xff] }
 0x23b   : > { %1706 = vmatprep.mubr.f32.mxu0 %v1364_v11  ;;  %2695 = vmatpush3.msra.mxu0 %v1618_v12  ;;  %v1872_v11 = vld [vmem:[#allocation18 + $0x298] sm:$0xff]  ;;  %v1821_v14 = vld [vmem:[#allocation18 + $0x100] sm:$0xff] }
 0x23c   : > { %2696 = vmatprep.subr.mxu0 %v1633_v13  ;;  %v1824_v12 = vld [vmem:[#allocation18 + $0x118] sm:$0xff]  ;;  %v1869_v13 = vld [vmem:[#allocation18 + $0x280] sm:$0xff] }
 0x23d   : > { %2697 = vmatpush3.msra.mxu0 %v1617_v15  ;;  %v1866_v15 = vld [vmem:[#allocation18 + $0x268] sm:$0xff] }
 0x23e   : > { %2698 = vmatprep.subr.mxu0 %v1632_v16  ;;  %v1818_v16 = vld [vmem:[#allocation18 + $0xe8] sm:$0xff] }
 0x23f   : > { %2699 = vmatpush3.msra.mxu0 %v1616_v17  ;;  %v1863_v17 = vld [vmem:[#allocation18 + $0x250] sm:$0xff] }
 0x240   : > { %2700 = vmatprep.subr.mxu0 %v1631_v18  ;;  %v1815_v18 = vld [vmem:[#allocation18 + $0xd0] sm:$0xff] }
 0x241   : > { %2701 = vmatpush3.msra.mxu0 %v1615_v19  ;;  %v1860_v19 = vld [vmem:[#allocation18 + $0x238] sm:$0xff] }
 0x242   : > { %2702 = vmatprep.subr.mxu0 %v1630_v20  ;;  %v1812_v20 = vld [vmem:[#allocation18 + $0xb8] sm:$0xff] }
 0x243   : > { %2703 = vmatpush3.msra.mxu0 %v1614_v21  ;;  %v1857_v21 = vld [vmem:[#allocation18 + $0x220] sm:$0xff] }
 0x244   : > { %2704 = vmatprep.subr.mxu0 %v1629_v22  ;;  %v1809_v22 = vld [vmem:[#allocation18 + $0xa0] sm:$0xff] }
 0x245   : > { %2705 = vmatpush3.msra.mxu0 %v1613_v23  ;;  %v1854_v23 = vld [vmem:[#allocation18 + $0x208] sm:$0xff] }
 0x246   : > { %2706 = vmatprep.subr.mxu0 %v1628_v24  ;;  %v1806_v24 = vld [vmem:[#allocation18 + $0x88] sm:$0xff] }
 0x247   : > { %2707 = vmatpush3.msra.mxu0 %v1612_v25  ;;  %v1851_v25 = vld [vmem:[#allocation18 + $0x1f0] sm:$0xff] }
 0x248   : > { %2708 = vmatprep.subr.mxu0 %v1627_v26  ;;  %v1803_v26 = vld [vmem:[#allocation18 + $0x70] sm:$0xff] }
 0x249   : > { %2709 = vmatpush3.msra.mxu0 %v1611_v27  ;;  %v1848_v27 = vld [vmem:[#allocation18 + $0x1d8] sm:$0xff] }
 0x24a   : > { %2710 = vmatprep.subr.mxu0 %v1626_v28  ;;  %v1800_v28 = vld [vmem:[#allocation18 + $0x58] sm:$0xff] }
 0x24b   : > { %2711 = vmatpush3.msra.mxu0 %v1610_v29  ;;  %v1845_v29 = vld [vmem:[#allocation18 + $0x1c0] sm:$0xff] }
 0x24c   : > { %2712 = vmatprep.subr.mxu0 %v1625_v30  ;;  %v1797_v30 = vld [vmem:[#allocation18 + $0x40] sm:$0xff] }
 0x24d   : > { %2713 = vmatpush3.msra.mxu0 %v1609_v31  ;;  %v1842_v31 = vld [vmem:[#allocation18 + $0x1a8] sm:$0xff] }
 0x24e   : > { %2714 = vmatprep.subr.mxu0 %v1624_v32  ;;  %v1794_v32 = vld [vmem:[#allocation18 + $0x28] sm:$0xff] }
 0x24f   : > { %2715 = vmatpush3.msra.mxu0 %v1608_v33  ;;  %v1839_v33 = vld [vmem:[#allocation18 + $0x190] sm:$0xff] }
 0x250   : > { %2716 = vmatprep.subr.mxu0 %v1623_v34  ;;  %v1791_v34 = vld [vmem:[#allocation18 + $0x10] sm:$0xff] }
 0x251   : > { %2717 = vmatpush3.msra.mxu0 %v1607_v35 }
 0x252   : > { %2718 = vmatprep.subr.mxu0 %v1622_v36  ;;  %v2623_v36 = vld [vmem:[%s4454_s8] ss:$0 sm:$0xff] }
 0x253   : > { %2719 = vmatpush3.msra.mxu0 %v1606_v37 }
 0x254   : > { %2720 = vmatprep.subr.mxu0 %v1621_v38 }
 0x255   : > { %2721 = vmatpush3.msra.mxu0 %v1605_v39 }
 0x256   : > { %2722 = vmatprep.subr.mxu0 %v1620_v40 }
 0x257   : > { %2723 = vmatpush3.msra.mxu0 %v1604_v41 }
 0x258   : > { %2724 = vmatprep.subr.mxu0 %v1619_v42 }
 0x259   : > { %2725 = vmatpush3.msra.mxu0 %v1603_v43 }
 0x25a   : > { %v4228_v60 = vpop.f32.mrf.mxu1  ;;  %2731 = vmatprep.subr.mxu0 %v1884_v62  ;;  %v1814_v62 = vld [vmem:[#allocation18 + $0xc8] sm:$0xff] }
 0x25c   : > { %v2924_v61 = vpop.f32.mrf.mxu1 }
 0x25d   : > { %v1816_v61 = vld [vmem:[#allocation18 + $0xd8] sm:$0xff] }
 0x2e9   : > { %v1272_v51 = vpop.f32.mrf.mxu0 }
 0x2ea   : > { %v1273_v52 = vadd.f32 %v1272_v51, %v1199_v49  ;;  %v1834_v49 = vld [vmem:[#allocation18 + $0x168] sm:$0xff]  ;;  %v1831_v51 = vld [vmem:[#allocation18 + $0x150] sm:$0xff] }
 0x2eb   : > { %v1274_v53 = vpop.f32.mrf.mxu0 }
 0x2ec   : > { %v1275_v54 = vadd.f32 %v1274_v53, %v1203_v50  ;;  %v1277_v55 = vmax.f32 %v1273_v52, 0.0  ;;  %v1832_v50 = vld [vmem:[#allocation18 + $0x158] sm:$0xff]  ;;  %v1829_v52 = vld [vmem:[#allocation18 + $0x140] sm:$0xff] }
 0x2ed   : > { %v1828_v53 = vld [vmem:[#allocation18 + $0x138] sm:$0xff] }
 0x2ee   : > { %v1278_v56 = vmax.f32 %v1275_v54, 0.0  ;;  %v1826_v54 = vld [vmem:[#allocation18 + $0x128] sm:$0xff] }
 0x2f0   : > { %v1279_v57 = vmul.f32 %v1278_v56, %v1277_v55  ;;  %v1825_v55 = vld [vmem:[#allocation18 + $0x120] sm:$0xff]  ;;  %v1823_v56 = vld [vmem:[#allocation18 + $0x110] sm:$0xff] }
 0x2f2   : > { %3204 = vtanh.f32 %v1279_v57  ;;  %v1822_v57 = vld [vmem:[#allocation18 + $0x108] sm:$0xff] }
 0x2fa   : > { %v4230_v63 = vpop.f32.mrf.mxu0 }
 0x2fc   : > { %v2929_v0 = vpop.f32.mrf.mxu0 }
 0x2fd   : > { %v1811_v0 = vld [vmem:[#allocation18 + $0xb0] sm:$0xff] }
 0x2ff   : > { %v4221_v59 = vpop.eup %3204 }
 0x300   : > { %2931 = vmatpush3.msra.mxu1 %v4221_v59 }
 0x301   : > { %2933 = vmatmul.mubr.msk.f32.vlgmr.msra.gmra.mxu1 %vm1455_vm4, %v1529_v58  ;;  %2935 = vmatprep.subr.mxu1 %v3679_v3  ;;  %v1820_v58 = vld [vmem:[#allocation18 + $0xf8] sm:$0xff] }
 0x302   : > { %2937 = vmatprep.mubr.msk.f32.mxu1 %vm3680_vm1, %v3679_v3  ;;  %v1830_v3 = vld [vmem:[#allocation18 + $0x148] sm:$0xff] }
 0x3c1   : > { %v1599_v2 = vpop.f32.mrf.mxu1 }
 0x3c2   : > { %1707 = vmatmul.mubr.f32.vlgmr.msra.gmra.mxu0 %v1599_v2  ;;  %v1808_v2 = vld [vmem:[#allocation18 + $0x98] sm:$0xff] }
 0x3c3   : > { %2732 = vmatpush3.msra.mxu0 %v1836_v1  ;;  %v2934_v6 = vpop.f32.mrf.mxu1  ;;  %2037 = vmatprep.mubr.f32.mxu0 %v4230_v63  ;;  %v1810_v1 = vld [vmem:[#allocation18 + $0xa8] sm:$0xff] }
 0x3c4   : > { %2733 = vmatprep.subr.mxu0 %v1881_v4  ;;  %v1807_v4 = vld [vmem:[#allocation18 + $0x90] sm:$0xff]  ;;  %v1804_v6 = vld [vmem:[#allocation18 + $0x78] sm:$0xff] }
 0x3c5   : > { %2734 = vmatpush3.msra.mxu0 %v1833_v5  ;;  %v1805_v5 = vld [vmem:[#allocation18 + $0x80] sm:$0xff] }
 0x3c6   : > { %2735 = vmatprep.subr.mxu0 %v1878_v7  ;;  %v1802_v7 = vld [vmem:[#allocation18 + $0x68] sm:$0xff] }
 0x3c7   : > { %2736 = vmatpush3.msra.mxu0 %v1830_v3  ;;  %v1801_v3 = vld [vmem:[#allocation18 + $0x60] sm:$0xff] }
 0x3c8   : > { %2737 = vmatprep.subr.mxu0 %v1875_v8  ;;  %v1799_v8 = vld [vmem:[#allocation18 + $0x50] sm:$0xff] }
 0x3c9   : > { %2738 = vmatpush3.msra.mxu0 %v1827_v10  ;;  %v1798_v10 = vld [vmem:[#allocation18 + $0x48] sm:$0xff] }
 0x3ca   : > { %2739 = vmatprep.subr.mxu0 %v1872_v11  ;;  %v1796_v11 = vld [vmem:[#allocation18 + $0x38] sm:$0xff] }
 0x3cb   : > { %2740 = vmatpush3.msra.mxu0 %v1824_v12  ;;  %v1795_v12 = vld [vmem:[#allocation18 + $0x30] sm:$0xff] }
 0x3cc   : > { %2741 = vmatprep.subr.mxu0 %v1869_v13  ;;  %v1793_v13 = vld [vmem:[#allocation18 + $0x20] sm:$0xff] }
 0x3cd   : > { %2742 = vmatpush3.msra.mxu0 %v1821_v14  ;;  %v1792_v14 = vld [vmem:[#allocation18 + $0x18] sm:$0xff] }
 0x3ce   : > { %2743 = vmatprep.subr.mxu0 %v1866_v15  ;;  %v1790_v15 = vld [vmem:[#allocation18 + $0x8] sm:$0xff] }
 0x3cf   : > { %2744 = vmatpush3.msra.mxu0 %v1818_v16  ;;  %v1789_v16 = vld [vmem:[#allocation18] sm:$0xff] }
 0x3d0   : > { %2745 = vmatprep.subr.mxu0 %v1863_v17  ;;  %v1883_v17 = vld [vmem:[#allocation18 + $0x2f0] sm:$0xff] }
 0x3d1   : > { %2746 = vmatpush3.msra.mxu0 %v1815_v18  ;;  %v1882_v18 = vld [vmem:[#allocation18 + $0x2e8] sm:$0xff] }
 0x3d2   : > { %2747 = vmatprep.subr.mxu0 %v1860_v19  ;;  %v1880_v19 = vld [vmem:[#allocation18 + $0x2d8] sm:$0xff] }
 0x3d3   : > { %2748 = vmatpush3.msra.mxu0 %v1812_v20  ;;  %v1879_v20 = vld [vmem:[#allocation18 + $0x2d0] sm:$0xff] }
 0x3d4   : > { %2749 = vmatprep.subr.mxu0 %v1857_v21  ;;  %v1877_v21 = vld [vmem:[#allocation18 + $0x2c0] sm:$0xff] }
 0x3d5   : > { %2750 = vmatpush3.msra.mxu0 %v1809_v22  ;;  %v1876_v22 = vld [vmem:[#allocation18 + $0x2b8] sm:$0xff] }
 0x3d6   : > { %2751 = vmatprep.subr.mxu0 %v1854_v23  ;;  %v1874_v23 = vld [vmem:[#allocation18 + $0x2a8] sm:$0xff] }
 0x3d7   : > { %2752 = vmatpush3.msra.mxu0 %v1806_v24  ;;  %v1873_v24 = vld [vmem:[#allocation18 + $0x2a0] sm:$0xff] }
 0x3d8   : > { %2753 = vmatprep.subr.mxu0 %v1851_v25  ;;  %v1871_v25 = vld [vmem:[#allocation18 + $0x290] sm:$0xff] }
 0x3d9   : > { %2754 = vmatpush3.msra.mxu0 %v1803_v26  ;;  %v1870_v26 = vld [vmem:[#allocation18 + $0x288] sm:$0xff] }
 0x3da   : > { %2755 = vmatprep.subr.mxu0 %v1848_v27  ;;  %v1868_v27 = vld [vmem:[#allocation18 + $0x278] sm:$0xff] }
 0x3db   : > { %2756 = vmatpush3.msra.mxu0 %v1800_v28  ;;  %v1867_v28 = vld [vmem:[#allocation18 + $0x270] sm:$0xff] }
 0x3dc   : > { %2757 = vmatprep.subr.mxu0 %v1845_v29  ;;  %v1865_v29 = vld [vmem:[#allocation18 + $0x260] sm:$0xff] }
 0x3dd   : > { %2758 = vmatpush3.msra.mxu0 %v1797_v30  ;;  %v1864_v30 = vld [vmem:[#allocation18 + $0x258] sm:$0xff] }
 0x3de   : > { %2759 = vmatprep.subr.mxu0 %v1842_v31  ;;  %v1862_v31 = vld [vmem:[#allocation18 + $0x248] sm:$0xff] }
 0x3df   : > { %2760 = vmatpush3.msra.mxu0 %v1794_v32  ;;  %v1861_v32 = vld [vmem:[#allocation18 + $0x240] sm:$0xff] }
 0x3e0   : > { %2761 = vmatprep.subr.mxu0 %v1839_v33  ;;  %v1859_v33 = vld [vmem:[#allocation18 + $0x230] sm:$0xff] }
 0x3e1   : > { %2762 = vmatpush3.msra.mxu0 %v1791_v34  ;;  %v1858_v34 = vld [vmem:[#allocation18 + $0x228] sm:$0xff] }
 0x3e2   : > { %2038 = vmatmul.mubr.f32.vlgmr.msra.gmra.mxu0 %v4221_v59 }
 0x482   : > { %v2726_v35 = vpop.f32.mrf.mxu0 }
 0x484   : > { %v2727_v37 = vpop.f32.mrf.mxu0 }
 0x485   : > { %v2728_v38 = vadd.f32 %v2727_v37, %v2726_v35  ;;  %v1856_v35 = vld [vmem:[#allocation18 + $0x218] sm:$0xff]  ;;  %v1853_v37 = vld [vmem:[#allocation18 + $0x200] sm:$0xff] }
 0x487   : > { %v1709_v39 = vadd.f32 %v2728_v38, %v2623_v36  ;;  %v1855_v36 = vld [vmem:[#allocation18 + $0x210] sm:$0xff]  ;;  %v1852_v38 = vld [vmem:[#allocation18 + $0x1f8] sm:$0xff] }
 0x489   : > { %v2624_v40 = vmul.f32 -1.442695, %v1709_v39  ;;  %v1850_v39 = vld [vmem:[#allocation18 + $0x1e8] sm:$0xff] }
 0x48b   : > { %3206 = vpow2.f32 %v2624_v40  ;;  %v1849_v40 = vld [vmem:[#allocation18 + $0x1e0] sm:$0xff] }
 0x498   : > { %v3207_v41 = vpop.eup %3206 }
 0x499   : > { %v1715_v42 = vadd.f32 1.0, %v3207_v41  ;;  %v1847_v41 = vld [vmem:[#allocation18 + $0x1d0] sm:$0xff] }
 0x49b   : > { %3208 = vrcp.f32 %v1715_v42  ;;  %v1846_v42 = vld [vmem:[#allocation18 + $0x1c8] sm:$0xff] }
 0x4a8   : > { %v3209_v43 = vpop.eup %3208 }
 0x4a9   : > { %v1718_v44 = vmul.f32 %v3209_v43, %v4228_v60  ;;  %v1817_v60 = vld [vmem:[#allocation18 + $0xe0] sm:$0xff]  ;;  %v1844_v43 = vld [vmem:[#allocation18 + $0x1b8] sm:$0xff] }
 0x4ab   : > { %2936 = vmatpush3.msra.mxu1 %v1718_v44  ;;  %v1843_v44 = vld [vmem:[#allocation18 + $0x1b0] sm:$0xff] }
 0x4ac   : > { %2938 = vmatmul.mubr.msk.f32.vlgmr.msra.gmra.mxu1 %vm1455_vm4, %v4204_v9  ;;  %1902 = vmatprep.subr.mxu1 %v1835_v47  ;;  %v1819_v9 = vld [vmem:[#allocation18 + $0xf0] sm:$0xff]  ;;  %v1841_v47 = vld [vmem:[#allocation18 + $0x1a0] sm:$0xff] }
 0x4ad   : > { %1903 = vmatpush1.msra.mxu1 %v1834_v49  ;;  %1966 = vmatprep.mubr.f32.mxu1 %v4230_v63  ;;  %v1813_v63 = vld [vmem:[#allocation18 + $0xc0] sm:$0xff]  ;;  %v1840_v49 = vld [vmem:[#allocation18 + $0x198] sm:$0xff] }
 0x4ae   : > { %1904 = vmatprep.subr.mxu1 %v1832_v50  ;;  %v1838_v50 = vld [vmem:[#allocation18 + $0x188] sm:$0xff] }
 0x4af   : > { %1905 = vmatpush1.msra.mxu1 %v1831_v51  ;;  %v1837_v51 = vld [vmem:[#allocation18 + $0x180] sm:$0xff] }
 0x4b0   : > { %1906 = vmatprep.subr.mxu1 %v1829_v52 }
 0x4b1   : > { %1907 = vmatpush1.msra.mxu1 %v1828_v53 }
 0x4b2   : > { %1908 = vmatprep.subr.mxu1 %v1826_v54  ;;  %v1885_v54 = vld [vmem:[%s4455_s27] sm:$0x7] }
 0x4b3   : > { %1909 = vmatpush1.msra.mxu1 %v1825_v55  ;;  %v1890_v55 = vrot.slane %v1885_v54, %v1198_v46 }
 0x4b4   : > { %1910 = vmatprep.subr.mxu1 %v1823_v56 }
 0x4b5   : > { %1911 = vmatpush1.msra.mxu1 %v1822_v57 }
 0x4b6   : > { %1912 = vmatprep.subr.mxu1 %v1820_v58 }
 0x4b7   : > { %1913 = vmatpush1.msra.mxu1 %v1819_v9  ;;  %v2763_v9 = vpop.f32.mrf.mxu0 }
 0x4b8   : > { %1914 = vmatprep.subr.mxu1 %v1817_v60  ;;  %v1894_v60 = vrot.slane %v1885_v54, %v1202_v48 }
 0x4b9   : > { %1915 = vmatpush1.msra.mxu1 %v1816_v61 }
 0x4ba   : > { %1916 = vmatprep.subr.mxu1 %v1814_v62  ;;  %v2764_v62 = vpop.f32.mrf.mxu0 }
 0x4bb   : > { %1917 = vmatpush1.msra.mxu1 %v1813_v63 }
 0x4bc   : > { %1918 = vmatprep.subr.mxu1 %v1811_v0 }
 0x4bd   : > { %1919 = vmatpush1.msra.mxu1 %v1810_v1  ;;  %v2765_v1 = vadd.f32 %v2764_v62, %v2763_v9 }
 0x4be   : > { %1920 = vmatprep.subr.mxu1 %v1808_v2 }
 0x4bf   : > { %1921 = vmatpush1.msra.mxu1 %v1807_v4 }
 0x4c0   : > { %1922 = vmatprep.subr.mxu1 %v1805_v5 }
 0x4c1   : > { %1923 = vmatpush1.msra.mxu1 %v1804_v6 }
 0x4c2   : > { %1924 = vmatprep.subr.mxu1 %v1802_v7 }
 0x4c3   : > { %1925 = vmatpush1.msra.mxu1 %v1801_v3 }
 0x4c4   : > { %1926 = vmatprep.subr.mxu1 %v1799_v8 }
 0x4c5   : > { %1927 = vmatpush1.msra.mxu1 %v1798_v10 }
 0x4c6   : > { %1928 = vmatprep.subr.mxu1 %v1796_v11 }
 0x4c7   : > { %1929 = vmatpush1.msra.mxu1 %v1795_v12 }
 0x4c8   : > { %1930 = vmatprep.subr.mxu1 %v1793_v13 }
 0x4c9   : > { %1931 = vmatpush1.msra.mxu1 %v1792_v14 }
 0x4ca   : > { %1932 = vmatprep.subr.mxu1 %v1790_v15 }
 0x4cb   : > { %1933 = vmatpush1.msra.mxu1 %v1789_v16 }
 0x4cc   : > { %1934 = vmatprep.subr.mxu1 %v1883_v17 }
 0x4cd   : > { %1935 = vmatpush2.msra.mxu1 %v1882_v18 }
 0x4ce   : > { %1936 = vmatprep.subr.mxu1 %v1880_v19 }
 0x4cf   : > { %1937 = vmatpush2.msra.mxu1 %v1879_v20 }
 0x4d0   : > { %1938 = vmatprep.subr.mxu1 %v1877_v21 }
 0x4d1   : > { %1939 = vmatpush2.msra.mxu1 %v1876_v22 }
 0x4d2   : > { %1940 = vmatprep.subr.mxu1 %v1874_v23 }
 0x4d3   : > { %1941 = vmatpush2.msra.mxu1 %v1873_v24 }
 0x4d4   : > { %1942 = vmatprep.subr.mxu1 %v1871_v25 }
 0x4d5   : > { %1943 = vmatpush2.msra.mxu1 %v1870_v26 }
 0x4d6   : > { %1944 = vmatprep.subr.mxu1 %v1868_v27 }
 0x4d7   : > { %1945 = vmatpush2.msra.mxu1 %v1867_v28 }
 0x4d8   : > { %1946 = vmatprep.subr.mxu1 %v1865_v29 }
 0x4d9   : > { %1947 = vmatpush2.msra.mxu1 %v1864_v30 }
 0x4da   : > { %1948 = vmatprep.subr.mxu1 %v1862_v31 }
 0x4db   : > { %1949 = vmatpush2.msra.mxu1 %v1861_v32 }
 0x4dc   : > { %1950 = vmatprep.subr.mxu1 %v1859_v33 }
 0x4dd   : > { %1951 = vmatpush2.msra.mxu1 %v1858_v34 }
 0x4de   : > { %1952 = vmatprep.subr.mxu1 %v1856_v35 }
 0x4df   : > { %1953 = vmatpush2.msra.mxu1 %v1855_v36 }
 0x4e0   : > { %1954 = vmatprep.subr.mxu1 %v1853_v37 }
 0x4e1   : > { %1955 = vmatpush2.msra.mxu1 %v1852_v38 }
 0x4e2   : > { %1956 = vmatprep.subr.mxu1 %v1850_v39 }
 0x4e3   : > { %1957 = vmatpush2.msra.mxu1 %v1849_v40 }
 0x4e4   : > { %1958 = vmatprep.subr.mxu1 %v1847_v41 }
 0x4e5   : > { %1959 = vmatpush2.msra.mxu1 %v1846_v42 }
 0x4e6   : > { %1960 = vmatprep.subr.mxu1 %v1844_v43 }
 0x4e7   : > { %1961 = vmatpush2.msra.mxu1 %v1843_v44 }
 0x4e8   : > { %1962 = vmatprep.subr.mxu1 %v1841_v47 }
 0x4e9   : > { %1963 = vmatpush2.msra.mxu1 %v1840_v49 }
 0x4ea   : > { %1964 = vmatprep.subr.mxu1 %v1838_v50 }
 0x4eb   : > { %1965 = vmatpush2.msra.mxu1 %v1837_v51 }
 0x4ec   : > { %1967 = vmatmul.mubr.f32.vlgmr.msra.gmra.mxu1 %v4221_v59  ;;  %v1897_v59 = vsub.s32 2, %v4208_v45 }
 0x4ee   : > { %v1898_v0 = vrot.slane %v1885_v54, %v1897_v59 }
 0x4f0   : > { %v2040_v4 = vadd.f32 %v2765_v1, %v1898_v0 }
 0x56c   : > { %v1785_v52 = vpop.f32.mrf.mxu1 }
 0x56e   : > { %v2939_v53 = vpop.f32.mrf.mxu1 }
 0x5ac   : > { %v1968_v56 = vpop.f32.mrf.mxu1 }
 0x5ad   : > { %v1969_v57 = vadd.f32 %v1968_v56, %v1890_v55 }
 0x5ae   : > { %v1970_v61 = vpop.f32.mrf.mxu1 }
 0x5af   : > { %v2626_v58 = vmul.f32 -1.442695, %v1969_v57  ;;  %v1971_v63 = vadd.f32 %v1970_v61, %v1894_v60 }
 0x5b1   : > { %3210 = vpow2.f32 %v2626_v58  ;;  %v2627_v2 = vmul.f32 -1.442695, %v1971_v63 }
 0x5b3   : > { %3212 = vpow2.f32 %v2627_v2 }
 0x5b4   : > { %3214 = vtanh.f32 %v2040_v4 }
 0x5be   : > { %v3211_v5 = vpop.eup %3210 }
 0x5bf   : > { %v2046_v46 = vadd.f32 1.0, %v3211_v5 }
 0x5c0   : > { %v3213_v6 = vpop.eup %3212 }
 0x5c1   : > { %3216 = vrcp.f32 %v2046_v46  ;;  %v3215_v7 = vpop.eup %3214  ;;  %v2052_v48 = vadd.f32 1.0, %v3213_v6 }
 0x5c3   : > { %3218 = vrcp.f32 %v2052_v48 }
 0x5ce   : > { %v3217_v3 = vpop.eup %3216 }
 0x5cf   : > { %v2056_v8 = vmul.f32 %v3217_v3, %v3215_v7 }
 0x5d0   : > { %v3219_v45 = vpop.eup %3218 }
 0x5d1   : > { %v2057_v10 = vadd.f32 %v2056_v8, %v1785_v52 }
 0x5d3   : > { %3220 = vtanh.f32 %v2057_v10  ;;  %2064 = vst [vmem:[%s2063_s22] sm:$0xff] %v2057_v10 }
 0x5df   : > { %2068 = sbr.rel (%p2629_p3) target bundleno = 2132 (0x854), region = 156 }
 0x5e0   : > { %v3221_v11 = vpop.eup %3220 }
 0x5e1   : > { %v2059_v12 = vmul.f32 %v3221_v11, %v3219_v45 }
 0x5e3   : > { %2062 = vst [vmem:[%s2061_s20] sm:$0xff] %v2059_v12 }
 0x5e4   : > { %v3681_v14 = vmov 0.0   ;;  %vm3682_vm5 = vmmov 0   ;;  %v2172_v18 = vld [vmem:[#allocation21 + $0x78] sm:$0xff]  ;;  %v2171_v19 = vld [vmem:[#allocation21 + $0x70] sm:$0xff]  ;;  %v2170_v21 = vld [vmem:[#allocation21 + $0x68] sm:$0xff] }
 0x5e5   : > { %2940 = vmatprep.subr.mxu0 %v3681_v14  ;;  %2972 = vmatprep.mubr.msk.f32.mxu0 %vm3682_vm5, %v3681_v14  ;;  %v2169_v23 = vld [vmem:[#allocation21 + $0x60] sm:$0xff]  ;;  %v2168_v25 = vld [vmem:[#allocation21 + $0x58] sm:$0xff]  ;;  %v2167_v27 = vld [vmem:[#allocation21 + $0x50] sm:$0xff] }
 0x5e6   : > { %2975 = vmatprep.subr.mxu1 %v3681_v14  ;;  %3007 = vmatprep.mubr.msk.f32.mxu1 %vm3682_vm5, %v3681_v14  ;;  %v2166_v29 = vld [vmem:[#allocation21 + $0x48] sm:$0xff]  ;;  %v2165_v31 = vld [vmem:[#allocation21 + $0x40] sm:$0xff]  ;;  %v2164_v33 = vld [vmem:[#allocation21 + $0x38] sm:$0xff] }
 0x5e7   : > { %2976 = vmatpush3.msra.mxu1 %v2172_v18  ;;  %v2163_v35 = vld [vmem:[#allocation21 + $0x30] sm:$0xff]  ;;  %v2162_v37 = vld [vmem:[#allocation21 + $0x28] sm:$0xff]  ;;  %v2161_v39 = vld [vmem:[#allocation21 + $0x20] sm:$0xff] }
 0x5e8   : > { %2977 = vmatprep.subr.mxu1 %v3681_v14  ;;  %v2160_v41 = vld [vmem:[#allocation21 + $0x18] sm:$0xff]  ;;  %v2159_v43 = vld [vmem:[#allocation21 + $0x10] sm:$0xff]  ;;  %v2158_v47 = vld [vmem:[#allocation21 + $0x8] sm:$0xff] }
 0x5e9   : > { %2978 = vmatpush3.msra.mxu1 %v2171_v19  ;;  %v2069_v44 = vld [vmem:[%s4456_s1] sm:$0xff]  ;;  %v2157_v49 = vld [vmem:[#allocation21] sm:$0xff]  ;;  %v2266_v50 = vld [vmem:[#allocation22 + $0x78] sm:$0xff] }
 0x5ea   : > { %v2085_v13 = vld [vmem:[#allocation2 + $0x78] sm:$0xff]  ;;  %v2084_v15 = vld [vmem:[#allocation2 + $0x70] sm:$0xff]  ;;  %v2083_v16 = vld [vmem:[#allocation2 + $0x68] sm:$0xff]  ;;  %2979 = vmatprep.subr.mxu1 %v3681_v14 }
 0x5eb   : > { %2941 = vmatpush3.msra.mxu0 %v2085_v13  ;;  %v2082_v17 = vld [vmem:[#allocation2 + $0x60] sm:$0xff]  ;;  %v2081_v20 = vld [vmem:[#allocation2 + $0x58] sm:$0xff]  ;;  %v2080_v22 = vld [vmem:[#allocation2 + $0x50] sm:$0xff]  ;;  %2980 = vmatpush3.msra.mxu1 %v2170_v21 }
 0x5ec   : > { %2942 = vmatprep.subr.mxu0 %v3681_v14  ;;  %v2079_v24 = vld [vmem:[#allocation2 + $0x48] sm:$0xff]  ;;  %2981 = vmatprep.subr.mxu1 %v3681_v14  ;;  %v2078_v26 = vld [vmem:[#allocation2 + $0x40] sm:$0xff]  ;;  %v2077_v28 = vld [vmem:[#allocation2 + $0x38] sm:$0xff] }
 0x5ed   : > { %2943 = vmatpush3.msra.mxu0 %v2084_v15  ;;  %2982 = vmatpush3.msra.mxu1 %v2169_v23  ;;  %v2076_v30 = vld [vmem:[#allocation2 + $0x30] sm:$0xff]  ;;  %v2075_v32 = vld [vmem:[#allocation2 + $0x28] sm:$0xff]  ;;  %v2074_v34 = vld [vmem:[#allocation2 + $0x20] sm:$0xff] }
 0x5ee   : > { %2944 = vmatprep.subr.mxu0 %v3681_v14  ;;  %2983 = vmatprep.subr.mxu1 %v3681_v14  ;;  %v2073_v36 = vld [vmem:[#allocation2 + $0x18] sm:$0xff]  ;;  %v2072_v38 = vld [vmem:[#allocation2 + $0x10] sm:$0xff]  ;;  %v2071_v40 = vld [vmem:[#allocation2 + $0x8] sm:$0xff] }
 0x5ef   : > { %2945 = vmatpush3.msra.mxu0 %v2083_v16  ;;  %2984 = vmatpush3.msra.mxu1 %v2168_v25  ;;  %v2070_v42 = vld [vmem:[#allocation2] sm:$0xff]  ;;  %v2264_v52 = vld [vmem:[#allocation22 + $0x68] sm:$0xff]  ;;  %v2263_v53 = vld [vmem:[#allocation22 + $0x60] sm:$0xff] }
 0x5f0   : > { %2946 = vmatprep.subr.mxu0 %v3681_v14  ;;  %2985 = vmatprep.subr.mxu1 %v3681_v14  ;;  %v2265_v51 = vld [vmem:[#allocation22 + $0x70] sm:$0xff]  ;;  %v2262_v54 = vld [vmem:[#allocation22 + $0x58] sm:$0xff]  ;;  %v2260_v56 = vld [vmem:[#allocation22 + $0x48] sm:$0xff] }
 0x5f1   : > { %2947 = vmatpush3.msra.mxu0 %v2082_v17  ;;  %2986 = vmatpush3.msra.mxu1 %v2167_v27  ;;  %v2261_v55 = vld [vmem:[#allocation22 + $0x50] sm:$0xff]  ;;  %v2259_v57 = vld [vmem:[#allocation22 + $0x40] sm:$0xff]  ;;  %v2258_v58 = vld [vmem:[#allocation22 + $0x38] sm:$0xff] }
 0x5f2   : > { %2948 = vmatprep.subr.mxu0 %v3681_v14  ;;  %2987 = vmatprep.subr.mxu1 %v3681_v14  ;;  %v2257_v9 = vld [vmem:[#allocation22 + $0x30] sm:$0xff]  ;;  %v2256_v60 = vld [vmem:[#allocation22 + $0x28] sm:$0xff]  ;;  %v2255_v61 = vld [vmem:[#allocation22 + $0x20] sm:$0xff] }
 0x5f3   : > { %2949 = vmatpush3.msra.mxu0 %v2081_v20  ;;  %2988 = vmatpush3.msra.mxu1 %v2166_v29  ;;  %v2254_v59 = vld [vmem:[#allocation22 + $0x18] sm:$0xff]  ;;  %v2253_v0 = vld [vmem:[#allocation22 + $0x10] sm:$0xff]  ;;  %v2252_v1 = vld [vmem:[#allocation22 + $0x8] sm:$0xff] }
 0x5f4   : > { %2950 = vmatprep.subr.mxu0 %v3681_v14  ;;  %2989 = vmatprep.subr.mxu1 %v3681_v14  ;;  %v2251_v2 = vld [vmem:[#allocation22] sm:$0xff]  ;;  %v2630_v4 = vld [vmem:[%s4457_s4] ss:$0 sm:$0xff] }
 0x5f5   : > { %2951 = vmatpush3.msra.mxu0 %v2080_v22  ;;  %2990 = vmatpush3.msra.mxu1 %v2165_v31  ;;  %v2631_v3 = vld [vmem:[%s4458_s3] ss:$0 sm:$0xff] }
 0x5f6   : > { %2952 = vmatprep.subr.mxu0 %v3681_v14  ;;  %2991 = vmatprep.subr.mxu1 %v3681_v14 }
 0x5f7   : > { %2953 = vmatpush3.msra.mxu0 %v2079_v24  ;;  %2992 = vmatpush3.msra.mxu1 %v2164_v33 }
 0x5f8   : > { %2954 = vmatprep.subr.mxu0 %v3681_v14  ;;  %2993 = vmatprep.subr.mxu1 %v3681_v14 }
 0x5f9   : > { %2955 = vmatpush3.msra.mxu0 %v2078_v26  ;;  %2994 = vmatpush3.msra.mxu1 %v2163_v35 }
 0x5fa   : > { %2956 = vmatprep.subr.mxu0 %v3681_v14  ;;  %2995 = vmatprep.subr.mxu1 %v3681_v14 }
 0x5fb   : > { %2957 = vmatpush3.msra.mxu0 %v2077_v28  ;;  %2996 = vmatpush3.msra.mxu1 %v2162_v37 }
 0x5fc   : > { %2958 = vmatprep.subr.mxu0 %v3681_v14  ;;  %2997 = vmatprep.subr.mxu1 %v3681_v14 }
 0x5fd   : > { %2959 = vmatpush3.msra.mxu0 %v2076_v30  ;;  %2998 = vmatpush3.msra.mxu1 %v2161_v39 }
 0x5fe   : > { %2960 = vmatprep.subr.mxu0 %v3681_v14  ;;  %2999 = vmatprep.subr.mxu1 %v3681_v14 }
 0x5ff   : > { %2961 = vmatpush3.msra.mxu0 %v2075_v32  ;;  %3000 = vmatpush3.msra.mxu1 %v2160_v41 }
 0x600   : > { %2962 = vmatprep.subr.mxu0 %v3681_v14  ;;  %3001 = vmatprep.subr.mxu1 %v3681_v14 }
 0x601   : > { %2963 = vmatpush3.msra.mxu0 %v2074_v34  ;;  %3002 = vmatpush3.msra.mxu1 %v2159_v43 }
 0x602   : > { %2964 = vmatprep.subr.mxu0 %v3681_v14  ;;  %3003 = vmatprep.subr.mxu1 %v3681_v14 }
 0x603   : > { %2965 = vmatpush3.msra.mxu0 %v2073_v36  ;;  %3004 = vmatpush3.msra.mxu1 %v2158_v47 }
 0x604   : > { %2966 = vmatprep.subr.mxu0 %v3681_v14  ;;  %3005 = vmatprep.subr.mxu1 %v3681_v14 }
 0x605   : > { %2967 = vmatpush3.msra.mxu0 %v2072_v38  ;;  %3006 = vmatpush3.msra.mxu1 %v2157_v49 }
 0x606   : > { %2968 = vmatprep.subr.mxu0 %v3681_v14 }
 0x607   : > { %2969 = vmatpush3.msra.mxu0 %v2071_v40 }
 0x608   : > { %2970 = vmatprep.subr.mxu0 %v3681_v14 }
 0x609   : > { %2971 = vmatpush3.msra.mxu0 %v2070_v42 }
 0x60a   : > { %2973 = vmatmul.mubr.f32.vlgmr.msra.gmra.mxu0 %v2069_v44  ;;  %3010 = vmatprep.subr.mxu0 %v3681_v14 }
 0x60b   : > { %3042 = vmatprep.mubr.msk.f32.mxu0 %vm3682_vm5, %v3681_v14  ;;  %3011 = vmatpush3.msra.mxu0 %v2266_v50 }
 0x60c   : > { %3012 = vmatprep.subr.mxu0 %v3681_v14 }
 0x60d   : > { %3013 = vmatpush3.msra.mxu0 %v2265_v51 }
 0x60e   : > { %3014 = vmatprep.subr.mxu0 %v3681_v14 }
 0x60f   : > { %3015 = vmatpush3.msra.mxu0 %v2264_v52 }
 0x610   : > { %3016 = vmatprep.subr.mxu0 %v3681_v14 }
 0x611   : > { %3017 = vmatpush3.msra.mxu0 %v2263_v53 }
 0x612   : > { %3018 = vmatprep.subr.mxu0 %v3681_v14 }
 0x613   : > { %3019 = vmatpush3.msra.mxu0 %v2262_v54 }
 0x614   : > { %3020 = vmatprep.subr.mxu0 %v3681_v14 }
 0x615   : > { %3021 = vmatpush3.msra.mxu0 %v2261_v55 }
 0x616   : > { %3022 = vmatprep.subr.mxu0 %v3681_v14 }
 0x617   : > { %3023 = vmatpush3.msra.mxu0 %v2260_v56 }
 0x618   : > { %3024 = vmatprep.subr.mxu0 %v3681_v14 }
 0x619   : > { %3025 = vmatpush3.msra.mxu0 %v2259_v57 }
 0x61a   : > { %3026 = vmatprep.subr.mxu0 %v3681_v14 }
 0x61b   : > { %3027 = vmatpush3.msra.mxu0 %v2258_v58 }
 0x61c   : > { %3028 = vmatprep.subr.mxu0 %v3681_v14 }
 0x61d   : > { %3029 = vmatpush3.msra.mxu0 %v2257_v9 }
 0x61e   : > { %3030 = vmatprep.subr.mxu0 %v3681_v14 }
 0x61f   : > { %3031 = vmatpush3.msra.mxu0 %v2256_v60 }
 0x620   : > { %3032 = vmatprep.subr.mxu0 %v3681_v14 }
 0x621   : > { %3033 = vmatpush3.msra.mxu0 %v2255_v61 }
 0x622   : > { %3034 = vmatprep.subr.mxu0 %v3681_v14 }
 0x623   : > { %3035 = vmatpush3.msra.mxu0 %v2254_v59 }
 0x624   : > { %3036 = vmatprep.subr.mxu0 %v3681_v14 }
 0x625   : > { %3037 = vmatpush3.msra.mxu0 %v2253_v0 }
 0x626   : > { %3038 = vmatprep.subr.mxu0 %v3681_v14 }
 0x627   : > { %3039 = vmatpush3.msra.mxu0 %v2252_v1 }
 0x628   : > { %3040 = vmatprep.subr.mxu0 %v3681_v14 }
 0x629   : > { %3041 = vmatpush3.msra.mxu0 %v2251_v2 }
 0x6ca   : > { %v2152_v62 = vpop.f32.mrf.mxu0 }
 0x6cb   : > { %2156 = vst [vmem:[#allocation25] sm:$0xff] %v2152_v62  ;;  %3008 = vmatmul.mubr.f32.vlgmr.msra.gmra.mxu1 %v2152_v62 }
 0x6cc   : > { %v2974_v63 = vpop.f32.mrf.mxu0 }
 0x78b   : > { %v2246_v5 = vpop.f32.mrf.mxu1 }
 0x78c   : > { %v2247_v46 = vadd.f32 %v2630_v4, %v2246_v5 }
 0x78d   : > { %v3009_v6 = vpop.f32.mrf.mxu1 }
 0x78e   : > { %v2250_v7 = vmax.f32 %v2247_v46, 0.0 }
 0x790   : > { %3043 = vmatmul.mubr.f32.vlgmr.msra.gmra.mxu0 %v2250_v7 }
 0x850   : > { %v2340_v48 = vpop.f32.mrf.mxu0 }
 0x851   : > { %v2341_v8 = vadd.f32 %v2631_v3, %v2340_v48 }
 0x852   : > { %v3044_v10 = vpop.f32.mrf.mxu0 }
 0x853   : > { %2344 = vst [vmem:[#allocation24] sm:$0xff] %v2341_v8 }
 0x854 PF: > { %p3144_p4 = scmp.eq.s32.totalorder %s3816_s29, 2  ;;  %s3683_s17 = smov [#allocation24]  }
 0x855   : > { %s2352_s30 = sshll.u32 %s3683_s17, 4  ;;  %s3684_s5 = smov [#allocation25]   ;;  %s2353_s30 = int_to_ptr.vmem [resolvable:$true] %s2352_s30 }
 0x856   : > { %s2363_s15 = sshll.u32 %s3684_s5, 4  ;;  %s3544_s23 = scalar_lea.vmem %s2353_s30, 128  ;;  %s2364_s15 = int_to_ptr.vmem [resolvable:$true] %s2363_s15 }
 0x857   : > { %p3545_p7 = scmp.ne.s32.totalorder %s2353_s30, %s3544_s23  ;;  %p3551_p9 = scmp.lt.s32.totalorder %s2353_s30, %s2353_s30 }
 0x858   : > { %p3552_p13 = scmp.lt.s32.totalorder %s3544_s23, %s3544_s23 }
 0x859   : > { %p3546_p5 = pnand %p3545_p7, %p3144_p4 }
 0x85a   : > { %p3553_p0 = por %p3552_p13, %p3551_p9 }
 0x85b   : > { %p3547_p11 = pneg %p3546_p5 }
 0x85d   : > { %p3554_p2 = pnand %p3553_p0, %p3547_p11 }
 0x85f   : > { %3557 = shalt.err (!%p3554_p2)
}
 0x860   : > { %s4459_s8 = sld [smem:[#allocation56_spill]]  ;;  %s3568_s2 = scalar_lea.vmem %s2364_s15, 128 }
 0x861   : > { %p3569_p8 = scmp.ne.s32.totalorder %s2364_s15, %s3568_s2  ;;  %p3575_p10 = scmp.lt.s32.totalorder %s2364_s15, %s2364_s15 }
 0x862   : > { %p3576_p1 = scmp.lt.s32.totalorder %s3568_s2, %s3568_s2 }
 0x863   : > { %p3570_p12 = pnand %p3569_p8, %p3144_p4 }
 0x864   : > { %p3577_p3 = por %p3576_p1, %p3575_p10 }
 0x865   : > { %p3571_p6 = pneg %p3570_p12 }
 0x866   : > { %3084 = dma.vmem_to_hbm [thread:$0]  (%p3144_p4), %s2353_s30, 128, %s4459_s8, [#allocation6]  }
 0x867   : > { %p3578_p7 = pnand %p3577_p3, %p3571_p6 }
 0x869   : > { %3581 = shalt.err (!%p3578_p7)
}
 0x86a   : > { %s4460_s12 = sld [smem:[#allocation57_spill]] }
 0x870   : > { %3086 = dma.vmem_to_hbm [thread:$0]  (%p3144_p4), %s2364_s15, 128, %s4460_s12, [#allocation26]  }
 0x871   : > { %3637 = dma.done.wait (%p3144_p4), [#allocation6], 128  }
 0x872   : > { %3639 = vsyncadd (%p3144_p4), [#allocation6], 4294967168 }
 0x873   : > { %3641 = dma.done.wait (%p3144_p4), [#allocation26], 128  }
 0x874   : > { %3643 = vsyncadd (%p3144_p4), [#allocation26], 4294967168 }
 0x875 PF: > { %s4461_s27 = sld [smem:[#allocation36_spill]]  ;;  %s4463_s2 = smov %s3650_s25 }
 0x876   : > { %s4462_s22 = sld [smem:[#allocation37_spill]]  ;;  %s4464_s25 = smov %s3654_s26 }
 0x87b   : > { %p44_p5 = scmp.ge.s32.totalorder %s4461_s27, 5  }
 0x87c   : > { %s4465_s26 = smov %s4462_s22 }
 0x87d   :  { %46 = sbr.rel (!%p44_p5) target bundleno = 34 (0x22), region = 231 }
 0x882   :  { %2380 = vsyncpa [#allocation5], 1 }
 0x883   :  { %2382 = vsyncpa [#allocation5 + $0x1], 1 }
 0x884   :  { %2383 = vsyncpa [#allocation8], 1 }
 0x885   :  { %2385 = vsyncpa [#allocation8 + $0x1], 1 }
 0x886   :  { %2386 = vsyncpa [#allocation11], 1 }
 0x887   :  { %2388 = vsyncpa [#allocation11 + $0x1], 1 }
 0x888   :  { %2389 = vsyncpa [#allocation14], 1 }
 0x889   :  { %2390 = vsyncpa [#allocation17], 1 }
 0x88a   :  { %2391 = vsyncpa [#allocation20], 1 }
 0x88b   :  { %2392 = vsyncpa [#allocation23], 1 }
 0x88c   :  { %2393 = vsyncpa [#allocation6], 1 }
 0x88d   :  { %2395 = vsyncpa [#allocation6 + $0x1], 1 }
 0x88e   :  { %2396 = vsyncpa [#allocation26], 1 }

</bundles_post_ra>
